<compile_context>
chip_gen: v6e
topology: v6e:2x2x1
jax: 0.10.0
libtpu: 0.0.40
codegen_flags: <defaults>
</compile_context>

<pallas_src>
import numpy as np
import jax
import jax.numpy as jnp
from jax.experimental import pallas as pl
from jax.experimental.pallas import tpu as pltpu

OUT_SIZE = 4096   # nn.Linear(64 * 2 * 2, 4096)
CONV_C = 64       # conv1 output channels
TN = 1024         # output-column tile (4096 / 1024 = 4 grid steps)


def _adaptive_pool_matrix(in_size: int, out_size: int) -> np.ndarray:
    """Averaging matrix (out_size, in_size) matching nn.AdaptiveAvgPool1d bins."""
    p = np.zeros((out_size, in_size), dtype=np.float32)
    for i in range(out_size):
        start = (i * in_size) // out_size
        end = -(-((i + 1) * in_size) // out_size)  # ceil
        p[i, start:end] = 1.0 / (end - start)
    return p


def predictor_kernel(xflat_ref, kpool_ref, mconv_ref, bconv_ref,
                     ppool_ref, wfc_ref, bfc_ref, out_ref):
    # Front-end (adaptive pool 4x4 + 3x3 conv + ReLU + 2x2 pool) is tiny and
    # recomputed each grid step so the output-column axis is idempotent
    # (safe under "parallel" / megacore sharding).
    xpad = jnp.dot(xflat_ref[...], kpool_ref[...],
                   preferred_element_type=jnp.float32)              # (B, 36)

    co = jnp.dot(xpad, mconv_ref[...],
                 preferred_element_type=jnp.float32)                # (B, 1024)
    co = jnp.maximum(co + bconv_ref[...], 0.0)                      # bias+ReLU

    # Fused 2x2 avg-pool (0.25 scale + flatten permutation baked into ppool).
    pooled = jnp.dot(co.astype(jnp.bfloat16), ppool_ref[...],
                     preferred_element_type=jnp.float32)            # (B, 256)

    # Linear(256 -> TN tile): single K=256 bf16 MXU matmul, bias in epilogue.
    out = jnp.dot(pooled.astype(jnp.bfloat16), wfc_ref[...],
                  preferred_element_type=jnp.float32)               # (B, TN)
    out_ref[...] = (out + bfc_ref[...]).astype(out_ref.dtype)


def predictor_forward(x, params):
    """Mirror of PredictorModel.forward for 4-D NCHW input with H, W >= 4."""
    conv_w = np.asarray(params["conv_w"], np.float32)   # (64, 1, 3, 3)
    conv_b = np.asarray(params["conv_b"], np.float32)   # (64,)
    fc_w = np.asarray(params["fc_w"], np.float32)       # (4096, 256)
    fc_b = np.asarray(params["fc_b"], np.float32)       # (4096,)

    if x.ndim == 2:
        # TODO(synk): 2-D input branch (view to (N,1,side,2) + bilinear
        # F.interpolate to 4x4) not implemented in this kernel.
        raise NotImplementedError("2-D input branch not implemented")
    assert x.ndim == 4
    xm = jnp.mean(x, axis=0, keepdims=True)          # (1, C, H, W)
    xm = jnp.transpose(xm, (1, 0, 2, 3))             # (C, 1, H, W)
    C, _, H, W = xm.shape
    if H < 4 or W < 4:
        # TODO(synk): bilinear F.interpolate branch not implemented.
        raise NotImplementedError("bilinear interpolate branch not implemented")
    x_flat = xm[:, 0, :, :].reshape(C, H * W).astype(jnp.float32)   # (B=C, H*W)

    # --- host-side parameter rearrangement ---
    # Fused adaptive-pool(4x4) + zero-pad(1) matrix: (H*W, 36).
    # TODO(synk): for very large H*W exploit separability (two small matmuls)
    # or tile the H*W reduction; untiled is fine for small images like 16x16.
    qh = np.zeros((6, H), np.float32)
    qh[1:5] = _adaptive_pool_matrix(H, 4)
    qw = np.zeros((6, W), np.float32)
    qw[1:5] = _adaptive_pool_matrix(W, 4)
    kpool = np.kron(qh, qw).T.astype(np.float32)     # (H*W, 36)

    # Conv weights unrolled to a (36, 16*64) im2col matrix; column p*64 + c.
    mconv = np.zeros((36, 16 * CONV_C), np.float32)
    for i in range(4):
        for j in range(4):
            p = i * 4 + j
            for di in range(3):
                for dj in range(3):
                    r, s = i + di, j + dj
                    mconv[r * 6 + s, p * CONV_C:(p + 1) * CONV_C] = conv_w[:, 0, di, dj]
    bconv_row = np.tile(conv_b, 16).reshape(1, 16 * CONV_C).astype(np.float32)

    # 2x2 avg-pool as a (1024, 256) matrix: ppool[p*64+c, q*64+c] = 0.25 when
    # spatial pixel p lies in the 2x2 block of pooled pixel q (0.25 is exact
    # in bf16).
    ppool = np.zeros((16, CONV_C, 4, CONV_C), np.float32)
    eye = 0.25 * np.eye(CONV_C, dtype=np.float32)
    for h in range(2):
        for w in range(2):
            q = h * 2 + w
            for di in range(2):
                for dj in range(2):
                    p = (2 * h + di) * 4 + (2 * w + dj)
                    ppool[p, :, q, :] = eye
    ppool = ppool.reshape(16 * CONV_C, 4 * CONV_C)

    # FC weight permuted so row q*64+c corresponds to PyTorch flatten c*4+q.
    wfc_flat = np.transpose(fc_w.reshape(OUT_SIZE, CONV_C, 4),
                            (2, 1, 0)).reshape(4 * CONV_C, OUT_SIZE)
    bfc_row = fc_b.reshape(1, OUT_SIZE).astype(np.float32)

    assert OUT_SIZE % TN == 0
    n_tiles = OUT_SIZE // TN

    out = pl.pallas_call(
        predictor_kernel,
        out_shape=jax.ShapeDtypeStruct((C, OUT_SIZE), jnp.float32),
        grid=(n_tiles,),
        in_specs=[
            pl.BlockSpec((C, H * W), lambda j: (0, 0)),            # x_flat
            pl.BlockSpec((H * W, 36), lambda j: (0, 0)),           # kpool
            pl.BlockSpec((36, 16 * CONV_C), lambda j: (0, 0)),     # mconv
            pl.BlockSpec((1, 16 * CONV_C), lambda j: (0, 0)),      # bconv
            pl.BlockSpec((16 * CONV_C, 4 * CONV_C), lambda j: (0, 0)),  # ppool
            pl.BlockSpec((4 * CONV_C, TN), lambda j: (0, j)),      # wfc tile
            pl.BlockSpec((1, TN), lambda j: (0, j)),               # bfc tile
        ],
        out_specs=pl.BlockSpec((C, TN), lambda j: (0, j)),
        compiler_params=pltpu.CompilerParams(
            dimension_semantics=("parallel",),
            vmem_limit_bytes=32 * 1024 * 1024),
    )(x_flat,
      jnp.asarray(kpool),
      jnp.asarray(mconv),
      jnp.asarray(bconv_row),
      jnp.asarray(ppool, dtype=jnp.bfloat16),
      jnp.asarray(wfc_flat, dtype=jnp.bfloat16),
      jnp.asarray(bfc_row))
    return out


def reference_forward(x, params):
    """Pure-JAX reference following the PyTorch ops (for H, W divisible by 4)."""
    conv_w, conv_b = params["conv_w"], params["conv_b"]
    fc_w, fc_b = params["fc_w"], params["fc_b"]
    xm = jnp.mean(x, axis=0, keepdims=True)
    xm = jnp.transpose(xm, (1, 0, 2, 3))                 # (C, 1, H, W)
    C, _, H, W = xm.shape
    xp = xm.reshape(C, 1, 4, H // 4, 4, W // 4).mean(axis=(3, 5))   # (C,1,4,4)
    y = jax.lax.conv_general_dilated(
        xp, conv_w, window_strides=(1, 1), padding=((1, 1), (1, 1)),
        dimension_numbers=("NCHW", "OIHW", "NCHW"))
    y = jax.nn.relu(y + conv_b.reshape(1, -1, 1, 1))     # (C, 64, 4, 4)
    y = y.reshape(C, CONV_C, 2, 2, 2, 2).mean(axis=(3, 5))           # (C,64,2,2)
    flat = y.reshape(C, -1)                              # (C, 256)
    return flat @ fc_w.T + fc_b


if __name__ == "__main__":
    key = jax.random.PRNGKey(0)
    kx, kw1, kb1, kw2, kb2 = jax.random.split(key, 5)
    x = jax.random.normal(kx, (2, 4, 16, 16), dtype=jnp.float32)
    params = {
        "conv_w": jax.random.normal(kw1, (CONV_C, 1, 3, 3), jnp.float32) * 0.1,
        "conv_b": jax.random.normal(kb1, (CONV_C,), jnp.float32) * 0.1,
        "fc_w": jax.random.normal(kw2, (OUT_SIZE, CONV_C * 2 * 2), jnp.float32) * 0.05,
        "fc_b": jax.random.normal(kb2, (OUT_SIZE,), jnp.float32) * 0.05,
    }

    out = jax.block_until_ready(predictor_forward(x, params))
    ref = jax.block_until_ready(reference_forward(x, params))
    assert out.shape == (4, OUT_SIZE)
    np.testing.assert_allclose(np.asarray(out), np.asarray(ref),
                               rtol=2e-3, atol=2e-3)
    print("KERNEL_OK")
</pallas_src>

<mosaic_0001>
module attributes {stable_mosaic.version = 11 : i64} {
  func.func @predictor_kernel(%arg0: i32, %arg1: memref<4x256xf32, #tpu.memory_space<vmem>>, %arg2: memref<256x36xf32, #tpu.memory_space<vmem>>, %arg3: memref<36x1024xf32, #tpu.memory_space<vmem>>, %arg4: memref<1x1024xf32, #tpu.memory_space<vmem>>, %arg5: memref<1024x256xbf16, #tpu.memory_space<vmem>>, %arg6: memref<256x1024xbf16, #tpu.memory_space<vmem>>, %arg7: memref<1x1024xf32, #tpu.memory_space<vmem>>, %arg8: memref<4x1024xf32, #tpu.memory_space<vmem>>) attributes {dimension_semantics = [#tpu.dimension_semantics<parallel>], iteration_bounds = array<i64: 4>, scalar_prefetch = 0 : i64, scratch_operands = 0 : i64, tpu.core_type = #tpu.core_type<tc>, window_params = [{pipeline_mode = #tpu.pipeline_mode<synchronous>, transform_indices = @transform_0, window_bounds = array<i64: 4, 256>}, {pipeline_mode = #tpu.pipeline_mode<synchronous>, transform_indices = @transform_1, window_bounds = array<i64: 256, 36>}, {pipeline_mode = #tpu.pipeline_mode<synchronous>, transform_indices = @transform_2, window_bounds = array<i64: 36, 1024>}, {pipeline_mode = #tpu.pipeline_mode<synchronous>, transform_indices = @transform_3, window_bounds = array<i64: 1, 1024>}, {pipeline_mode = #tpu.pipeline_mode<synchronous>, transform_indices = @transform_4, window_bounds = array<i64: 1024, 256>}, {transform_indices = @transform_5, window_bounds = array<i64: 256, 1024>}, {transform_indices = @transform_6, window_bounds = array<i64: 1, 1024>}, {transform_indices = @transform_7, window_bounds = array<i64: 4, 1024>}]} {
    %c0 = arith.constant 0 : index
    %c0_0 = arith.constant 0 : index
    %0 = vector.load %arg1[%c0, %c0_0] : memref<4x256xf32, #tpu.memory_space<vmem>>, vector<4x256xf32>
    %c0_1 = arith.constant 0 : index
    %c0_2 = arith.constant 0 : index
    %1 = vector.load %arg2[%c0_1, %c0_2] : memref<256x36xf32, #tpu.memory_space<vmem>>, vector<256x36xf32>
    %cst = arith.constant dense<0.000000e+00> : vector<4x36xf32>
    %2 = tpu.matmul %0, %1, %cst {dimension_numbers = #tpu.dot_dimension_numbers<[1], [0], [0], [1], [0, 0, 1, 1], [], []>} : vector<4x256xf32>, vector<256x36xf32>, vector<4x36xf32> -> vector<4x36xf32>
    %c0_3 = arith.constant 0 : index
    %c0_4 = arith.constant 0 : index
    %3 = vector.load %arg3[%c0_3, %c0_4] : memref<36x1024xf32, #tpu.memory_space<vmem>>, vector<36x1024xf32>
    %cst_5 = arith.constant dense<0.000000e+00> : vector<4x1024xf32>
    %4 = tpu.matmul %2, %3, %cst_5 {dimension_numbers = #tpu.dot_dimension_numbers<[1], [0], [0], [1], [0, 0, 1, 1], [], []>} : vector<4x36xf32>, vector<36x1024xf32>, vector<4x1024xf32> -> vector<4x1024xf32>
    %c0_6 = arith.constant 0 : index
    %c0_7 = arith.constant 0 : index
    %5 = vector.load %arg4[%c0_6, %c0_7] : memref<1x1024xf32, #tpu.memory_space<vmem>>, vector<1x1024xf32>
    %6 = vector.broadcast %5 : vector<1x1024xf32> to vector<4x1024xf32>
    %7 = arith.addf %4, %6 : vector<4x1024xf32>
    %cst_8 = arith.constant 0.000000e+00 : f32
    %8 = vector.broadcast %cst_8 : f32 to vector<4x1024xf32>
    %9 = arith.maximumf %7, %8 : vector<4x1024xf32>
    %10 = arith.truncf %9 : vector<4x1024xf32> to vector<4x1024xbf16>
    %c0_9 = arith.constant 0 : index
    %c0_10 = arith.constant 0 : index
    %11 = vector.load %arg5[%c0_9, %c0_10] : memref<1024x256xbf16, #tpu.memory_space<vmem>>, vector<1024x256xbf16>
    %cst_11 = arith.constant dense<0.000000e+00> : vector<4x256xf32>
    %12 = tpu.matmul %10, %11, %cst_11 {dimension_numbers = #tpu.dot_dimension_numbers<[1], [0], [0], [1], [0, 0, 1, 1], [], []>} : vector<4x1024xbf16>, vector<1024x256xbf16>, vector<4x256xf32> -> vector<4x256xf32>
    %13 = arith.truncf %12 : vector<4x256xf32> to vector<4x256xbf16>
    %c0_12 = arith.constant 0 : index
    %c0_13 = arith.constant 0 : index
    %14 = vector.load %arg6[%c0_12, %c0_13] : memref<256x1024xbf16, #tpu.memory_space<vmem>>, vector<256x1024xbf16>
    %cst_14 = arith.constant dense<0.000000e+00> : vector<4x1024xf32>
    %15 = tpu.matmul %13, %14, %cst_14 {dimension_numbers = #tpu.dot_dimension_numbers<[1], [0], [0], [1], [0, 0, 1, 1], [], []>} : vector<4x256xbf16>, vector<256x1024xbf16>, vector<4x1024xf32> -> vector<4x1024xf32>
    %c0_15 = arith.constant 0 : index
    %c0_16 = arith.constant 0 : index
    %16 = vector.load %arg7[%c0_15, %c0_16] : memref<1x1024xf32, #tpu.memory_space<vmem>>, vector<1x1024xf32>
    %17 = vector.broadcast %16 : vector<1x1024xf32> to vector<4x1024xf32>
    %18 = arith.addf %15, %17 : vector<4x1024xf32>
    %c0_17 = arith.constant 0 : index
    %c0_18 = arith.constant 0 : index
    %19 = vector.load %arg8[%c0_17, %c0_18] : memref<4x1024xf32, #tpu.memory_space<vmem>>, vector<4x1024xf32>
    tpu.vector_store %arg8[%c0_17, %c0_18], %18 {strides = array<i32>} : memref<4x1024xf32, #tpu.memory_space<vmem>>, vector<4x1024xf32>,
    return
  }
  func.func @transform_0(%arg0: i32) -> (i32, i32) {
    %c0_i32 = arith.constant 0 : i32
    %c0_i32_0 = arith.constant 0 : i32
    %c0_i32_1 = arith.constant 0 : i32
    return %c0_i32, %c0_i32_0 : i32, i32
  }
  func.func @transform_1(%arg0: i32) -> (i32, i32) {
    %c0_i32 = arith.constant 0 : i32
    %c0_i32_0 = arith.constant 0 : i32
    %c0_i32_1 = arith.constant 0 : i32
    return %c0_i32, %c0_i32_0 : i32, i32
  }
  func.func @transform_2(%arg0: i32) -> (i32, i32) {
    %c0_i32 = arith.constant 0 : i32
    %c0_i32_0 = arith.constant 0 : i32
    %c0_i32_1 = arith.constant 0 : i32
    return %c0_i32, %c0_i32_0 : i32, i32
  }
  func.func @transform_3(%arg0: i32) -> (i32, i32) {
    %c0_i32 = arith.constant 0 : i32
    %c0_i32_0 = arith.constant 0 : i32
    %c0_i32_1 = arith.constant 0 : i32
    return %c0_i32, %c0_i32_0 : i32, i32
  }
  func.func @transform_4(%arg0: i32) -> (i32, i32) {
    %c0_i32 = arith.constant 0 : i32
    %c0_i32_0 = arith.constant 0 : i32
    %c0_i32_1 = arith.constant 0 : i32
    return %c0_i32, %c0_i32_0 : i32, i32
  }
  func.func @transform_5(%arg0: i32) -> (i32, i32) {
    %c0_i32 = arith.constant 0 : i32
    %c0_i32_0 = arith.constant 0 : i32
    return %c0_i32, %arg0 : i32, i32
  }
  func.func @transform_6(%arg0: i32) -> (i32, i32) {
    %c0_i32 = arith.constant 0 : i32
    %c0_i32_0 = arith.constant 0 : i32
    return %c0_i32, %arg0 : i32, i32
  }
  func.func @transform_7(%arg0: i32) -> (i32, i32) {
    %c0_i32 = arith.constant 0 : i32
    %c0_i32_0 = arith.constant 0 : i32
    return %c0_i32, %arg0 : i32, i32
  }
}

</mosaic_0001>

<bundles_post_ra>
// kernel: tpu_custom_call.1
= control target key start
LH: loop header
LB: loop body
LE: loop exit
PB: predicated region body
PF: predicated region fallthrough
CT: control target
= control target key end

     0   :  { %s4449_s0 = inlined_call_operand.hbm [shape: f32[4,256], index: 0, kind: input, shape index: {}]   ;;  %s4450_s1 = inlined_call_operand.vmem [shape: f32[256,36], index: 1, kind: input, shape index: {}]   ;;  %s4451_s2 = inlined_call_operand.hbm [shape: f32[36,1024], index: 2, kind: input, shape index: {}]   ;;  %s4452_s3 = inlined_call_operand.hbm [shape: f32[1,1024], index: 3, kind: input, shape index: {}]   ;;  %s4453_s4 = inlined_call_operand.hbm [shape: bf16[1024,256], index: 4, kind: input, shape index: {}]   ;;  %s4454_s5 = inlined_call_operand.hbm [shape: bf16[256,4096], index: 5, kind: input, shape index: {}]   ;;  %s4455_s6 = inlined_call_operand.hbm [shape: f32[1,4096], index: 6, kind: input, shape index: {}]   ;;  %s4456_s7 = inlined_call_operand.hbm [shape: f32[4,4096], index: 7, kind: output, shape index: {}]  }
   0x1   :  { %4466 = sst [smem:[#allocation22_spill]] %s4449_s0 }
   0x2   :  { %4467 = sst [smem:[#allocation23_spill]] %s4451_s2 }
   0x3   :  { %12 = vsyncpa [#allocation3], 0 }
   0x4   :  { %13 = vsyncpa [#allocation6], 0 }
   0x5   :  { %14 = vsyncpa [#allocation9], 0 }
   0x6   :  { %15 = vsyncpa [#allocation4], 0 }
   0x7   :  { %17 = vsyncpa [#allocation4 + $0x1], 0  ;;  %s3893_s24 = smov 0   ;;  %s3895_s25 = smov 0  }
   0x8   :  { %s3897_s26 = smov 0   ;;  %s3899_s27 = smov 0  }
   0x9 LB: > { %4468 = sst [smem:[#allocation18_spill]] %s3824_s24  ;;  %s3914_s28 = sadd.s32 4294967295, %s3836_s27   ;;  %s3836_s27 = sphi %s3899_s27, %s4495_s27   ;;  %s3832_s26 = sphi %s3897_s26, %s4499_s26   ;;  %s3828_s25 = sphi %s3895_s25, %s4498_s25   ;;  %s3824_s24 = sphi %s3893_s24, %s4497_s24  }
   0xa   : > { %s2975_s29 = sadd.s32 4294967294, %s3836_s27   ;;  %s3918_s30 = sadd.s32 1, %s3836_s27  }
   0xb   : > { %4469 = sst [smem:[#allocation19_spill]] %s3918_s30  ;;  %s135_s8 = sadd.s32 1, %s3832_s26 }
   0xc   : > { %s132_s9 = ssub.s32 %s3836_s27, %s3918_s30  ;;  %p142_p0 = scmp.ne.s32.totalorder %s3832_s26, %s3828_s25 }
   0xd   : > { %p133_p1 = scmp.eq.s32.totalorder %s132_s9, 0  ;;  %p143_p2 = scmp.eq.s32.totalorder %s3836_s27, 0 }
   0xe   : > { %p148_p3 = scmp.ne.s32.totalorder %s3828_s25, %s3824_s24  ;;  %p4457_p4 = scmp.eq.s32.totalorder %s3914_s28, 0 }
   0xf   : > { %s3930_s10 = scalar_select %p133_p1, %s3832_s26, %s135_s8  }
  0x10   : > { %p3932_p5 = por %p143_p2, %p142_p0  ;;  %p3938_p6 = por %p4457_p4, %p148_p3 }
  0x11   : > { %4470 = sst [smem:[#allocation20_spill]] %s3930_s10  ;;  %p198_p7 = scmp.eq.s32.totalorder %s3914_s28, 3 }
  0x12   : > { %s4472_s12 = scalar_select %p3938_p6, 1, 0 }
  0x13   : > { %p204_p8 = scmp.eq.s32.totalorder %s2975_s29, 3  ;;  %p2976_p9 = scmp.ge.s32.totalorder %s3836_s27, 1 }
  0x14   : > { %p211_p10 = scmp.lt.s32.totalorder %s3836_s27, 5  ;;  %p3945_p11 = por %p198_p7, %p142_p0 }
  0x15   : > { %p3949_p12 = por %p204_p8, %p148_p3  ;;  %s3838_s16 = smov [#allocation2]  }
  0x16   : > { %s4473_s13 = scalar_select %p3945_p11, 1, 0 }
  0x17   : > { %s4474_s14 = scalar_select %p3949_p12, 1, 0 }
  0x18   : > { %p3953_p13 = pnand %p2976_p9, %p211_p10  ;;  %s224_s17 = sshll.u32 %s3838_s16, 4  ;;  %s225_s17 = int_to_ptr.vmem [resolvable:$true] %s224_s17 }
  0x19   : > { %4475 = sst [smem:[#allocation21_spill]] %s4474_s14  ;;  %p3357_p2 = scmp.lt.s32.totalorder %s3836_s27, 4 }
  0x1a   : > { %s4476_s15 = scalar_select %p3953_p13, 1, 0 }
  0x1b   : > { %p3329_p1 = pneg %p3953_p13  ;;  %p3968_p3 = pnand %p3357_p2, %p3932_p5 }
  0x1c   : > { %s3839_s20 = smov [#allocation5]   ;;  %s3611_s22 = scalar_lea.vmem %s225_s17, 128 }
  0x1d   : > { %p3962_p0 = pnand %p3329_p1, %p4457_p4  ;;  %s237_s21 = sshll.u32 %s3839_s20, 4  ;;  %s238_s21 = int_to_ptr.vmem [resolvable:$true] %s237_s21 }
  0x1e   : > { %p3612_p8 = scmp.ne.s32.totalorder %s225_s17, %s3611_s22  ;;  %p3619_p1 = scmp.lt.s32.totalorder %s225_s17, %s225_s17 }
  0x1f   : > { %p4464_p7 = pneg %p3962_p0  ;;  %p3620_p4 = scmp.lt.s32.totalorder %s3611_s22, %s3611_s22 }
  0x21   : > { %p3614_p9 = pnand %p3612_p8, %p4464_p7  ;;  %p3621_p12 = por %p3620_p4, %p3619_p1 }
  0x23   : > { %p3615_p10 = pneg %p3614_p9 }
  0x25   : > { %p3622_p11 = pnand %p3621_p12, %p3615_p10 }
  0x27   : > { %3625 = shalt.err (!%p3622_p11)
}
  0x28   : > { %s4479_s0 = sld [smem:[#allocation22_spill]]  ;;  %s275_s8 = sand.u32 1, %s3836_s27  }
  0x29   : > { %s3637_s9 = scalar_lea.vmem %s238_s21, 5120  ;;  %p3645_p9 = scmp.lt.s32.totalorder %s238_s21, %s238_s21 }
  0x2a   : > { %p3638_p5 = scmp.ne.s32.totalorder %s238_s21, %s3637_s9  ;;  %p3646_p6 = scmp.lt.s32.totalorder %s3637_s9, %s3637_s9 }
  0x2c   : > { %p3640_p2 = pnand %p3638_p5, %p4464_p7  ;;  %p3647_p4 = por %p3646_p6, %p3645_p9 }
  0x2e   : > { %3332 = dma.hbm_to_vmem [thread:$0]  (!%p3962_p0), %s4479_s0, 128, %s225_s17, [#allocation3]  }
  0x2f   : > { %p3641_p8 = pneg %p3640_p2 }
  0x31   : > { %p3648_p12 = pnand %p3647_p4, %p3641_p8 }
  0x33   : > { %3651 = shalt.err (!%p3648_p12)
}
  0x34   : > { %s3840_s11 = smov 1024   ;;  %s3841_s16 = smov 64  }
  0x35   : > { %s4480_s2 = sld [smem:[#allocation23_spill]]  ;;  %s277_s22 = sand.u32 1, %s3832_s26  }
  0x36   : > { %s2982_s23 = sshll.u32 %s277_s22, 10  ;;  %s3269_s29 = sshll.u32 %s3836_s27, 9 }
  0x37   : > { %s3998_s10 = scalar_lea.hbm %s4454_s5, %s3269_s29  ;;  %s279_s30 = scalar_lea.vmem [#allocation10], %s2982_s23 }
  0x38   : > { %s286_s14 = sshll.u32 %s279_s30, 4  ;;  %s4002_s24 = scalar_lea.sflag [#allocation3], %s275_s8  ;;  %s4000_s14 = int_to_ptr.vmem [resolvable:$true] %s286_s14 }
  0x39   : > { %s3652_s17 = scalar_lea.hbm %s3998_s10, 16384  ;;  %p3654_p11 = pneg %p3968_p3 }
  0x3a   : > { %p3653_p6 = scmp.ne.s32.totalorder %s3998_s10, %s3652_s17  ;;  %p3658_p5 = scmp.lt.s32.totalorder %s3998_s10, %s4454_s5 }
  0x3b   : > { %3335 = dma.hbm_to_vmem [thread:$0]  (!%p3962_p0), %s4480_s2, 5120, %s238_s21, [#allocation6], %s3840_s11, %s3840_s11, %s3841_s16  }
  0x3c   : > { %p3655_p10 = pnand %p3654_p11, %p3653_p6  ;;  %s3657_s11 = scalar_lea.hbm %s4454_s5, 65536 }
  0x3d   : > { %p3659_p2 = scmp.lt.s32.totalorder %s3657_s11, %s3652_s17 }
  0x3e   : > { %p3656_p1 = pneg %p3655_p10 }
  0x3f   : > { %p3660_p8 = por %p3659_p2, %p3658_p5 }
  0x41   : > { %p3661_p9 = pnand %p3660_p8, %p3656_p1 }
  0x43   : > { %3664 = shalt.err (!%p3661_p9)
}
  0x44   : > { %s3665_s30 = scalar_lea.vmem %s4000_s14, 16384  ;;  %s3842_s8 = smov [#allocation10]  }
  0x45   : > { %p3666_p4 = scmp.ne.s32.totalorder %s4000_s14, %s3665_s30  ;;  %s3670_s23 = sshll.u32 %s3842_s8, 4  ;;  %s3671_s23 = int_to_ptr.vmem [resolvable:$false] %s3670_s23 }
  0x46   : > { %s3672_s29 = scalar_lea.vmem %s3671_s23, 32768  ;;  %p3673_p10 = scmp.lt.s32.totalorder %s4000_s14, %s3671_s23 }
  0x47   : > { %p3668_p12 = pnand %p3666_p4, %p3654_p11  ;;  %p3674_p7 = scmp.lt.s32.totalorder %s3672_s29, %s3665_s30 }
  0x49   : > { %p3669_p6 = pneg %p3668_p12  ;;  %p3675_p13 = por %p3674_p7, %p3673_p10 }
  0x4b   : > { %p3676_p5 = pnand %p3675_p13, %p3669_p6 }
  0x4d   : > { %3679 = shalt.err (!%p3676_p5)
}
  0x4e   : > { %s3843_s9 = smov 2048   ;;  %s3844_s17 = smov 512  }
  0x4f   : > { %s3845_s0 = smov 32   ;;  %s3846_s21 = smov [#allocation7]  }
  0x50   : > { %3345 = dma.hbm_to_vmem [thread:$0]  (!%p3968_p3), %s3998_s10, 16384, %s4000_s14, %s4002_s24, %s3843_s9, %s3844_s17, %s3845_s0  }
  0x51   : > { %s251_s11 = sshll.u32 %s3846_s21, 4  ;;  %s3847_s16 = smov [#allocation8]   ;;  %s252_s11 = int_to_ptr.vmem [resolvable:$true] %s251_s11 }
  0x52   : > { %s261_s20 = sshll.u32 %s3847_s16, 4  ;;  %s3691_s8 = scalar_lea.vmem %s252_s11, 128  ;;  %s262_s20 = int_to_ptr.vmem [resolvable:$true] %s261_s20 }
  0x53   : > { %p3692_p1 = scmp.ne.s32.totalorder %s252_s11, %s3691_s8  ;;  %p4481_p13 = pneg %p3962_p0 }
  0x54   : > { %p3699_p8 = scmp.lt.s32.totalorder %s252_s11, %s252_s11  ;;  %p3700_p9 = scmp.lt.s32.totalorder %s3691_s8, %s3691_s8 }
  0x55   : > { %p3694_p7 = pnand %p3692_p1, %p4481_p13 }
  0x56   : > { %p3701_p4 = por %p3700_p9, %p3699_p8 }
  0x57   : > { %p3695_p2 = pneg %p3694_p7 }
  0x59   : > { %p3702_p12 = pnand %p3701_p4, %p3695_p2 }
  0x5b   : > { %3705 = shalt.err (!%p3702_p12)
}
  0x5c   : > { %3338 = dma.hbm_to_vmem [thread:$0]  (!%p3962_p0), %s4452_s3, 128, %s252_s11, [#allocation6]  }
  0x5d   : > { %s2985_s14 = sshll.u32 %s277_s22, 3  ;;  %s3717_s23 = scalar_lea.vmem %s262_s20, 16384 }
  0x5e   : > { %p3718_p6 = scmp.ne.s32.totalorder %s262_s20, %s3717_s23  ;;  %p4482_p10 = pmov %p4481_p13 }
  0x5f   : > { %p3725_p13 = scmp.lt.s32.totalorder %s262_s20, %s262_s20  ;;  %p3726_p7 = scmp.lt.s32.totalorder %s3717_s23, %s3717_s23 }
  0x60   : > { %p3720_p5 = pnand %p3718_p6, %p4482_p10 }
  0x61   : > { %p3727_p2 = por %p3726_p7, %p3725_p13 }
  0x62   : > { %p3721_p1 = pneg %p3720_p5 }
  0x64   : > { %p3728_p8 = pnand %p3727_p2, %p3721_p1 }
  0x66   : > { %3731 = shalt.err (!%p3728_p8)
}
  0x67   : > { %s3848_s29 = smov 128   ;;  %s3849_s9 = smov 8  }
  0x68   : > { %3341 = dma.hbm_to_vmem [thread:$0]  (!%p3962_p0), %s4453_s4, 16384, %s262_s20, [#allocation9], %s3848_s29, %s3848_s29, %s3849_s9  }
  0x69   : > { %s3270_s22 = sshll.u32 %s3836_s27, 7  ;;  %s300_s8 = scalar_lea.vmem [#allocation11], %s2985_s14 }
  0x6a   : > { %s306_s16 = scalar_lea.hbm %s4455_s6, %s3270_s22  ;;  %s308_s30 = sshll.u32 %s300_s8, 4  ;;  %s309_s30 = int_to_ptr.vmem [resolvable:$true] %s308_s30 }
  0x6b   : > { %s3732_s10 = scalar_lea.hbm %s306_s16, 128  ;;  %s3737_s2 = scalar_lea.hbm %s4455_s6, 512 }
  0x6c   : > { %p3733_p9 = scmp.ne.s32.totalorder %s306_s16, %s3732_s10  ;;  %p3738_p0 = scmp.lt.s32.totalorder %s306_s16, %s4455_s6 }
  0x6d   : > { %p3739_p6 = scmp.lt.s32.totalorder %s3737_s2, %s3732_s10 }
  0x6e   : > { %p3735_p4 = pnand %p3733_p9, %p3654_p11 }
  0x6f   : > { %p3740_p10 = por %p3739_p6, %p3738_p0 }
  0x70   : > { %p3736_p12 = pneg %p3735_p4 }
  0x72   : > { %p3741_p5 = pnand %p3740_p10, %p3736_p12 }
  0x74   : > { %3744 = shalt.err (!%p3741_p5)
}
  0x75   : > { %s3745_s14 = scalar_lea.vmem %s309_s30, 128  ;;  %s3850_s29 = smov [#allocation11]  }
  0x76   : > { %p3746_p1 = scmp.ne.s32.totalorder %s309_s30, %s3745_s14  ;;  %s3750_s9 = sshll.u32 %s3850_s29, 4  ;;  %s3751_s9 = int_to_ptr.vmem [resolvable:$false] %s3750_s9 }
  0x77   : > { %s3752_s0 = scalar_lea.vmem %s3751_s9, 256  ;;  %p3753_p2 = scmp.lt.s32.totalorder %s309_s30, %s3751_s9 }
  0x78   : > { %p3748_p13 = pnand %p3746_p1, %p3654_p11  ;;  %p3754_p8 = scmp.lt.s32.totalorder %s3752_s0, %s3745_s14 }
  0x7a   : > { %p3749_p7 = pneg %p3748_p13  ;;  %p3755_p9 = por %p3754_p8, %p3753_p2 }
  0x7c   : > { %p3756_p4 = pnand %p3755_p9, %p3749_p7 }
  0x7e   : > { %3759 = shalt.err (!%p3756_p4)
}
  0x7f   : > { %3348 = dma.hbm_to_vmem [thread:$0]  (!%p3968_p3), %s306_s16, 128, %s309_s30, %s4002_s24  }
  0x80   : > { %p4483_p12 = scmp.ne.s32.totalorder %s4476_s15, 0 }
  0x81   : > { %p4484_p0 = scmp.eq.s32.totalorder (!%p4483_p12), %s3914_s28, 0 }
  0x82   : > { %317 = sbr.rel (%p4483_p12) target bundleno = 1129 (0x469), region = 48 }
  0x87   : > { %3803 = dma.done.wait (%p4484_p0), [#allocation3], 128   ;;  %p4485_p11 = pmov %p4484_p0 }
  0x88   : > { %p4486_p6 = pmov %p4484_p0 }
  0x89   : > { %3805 = vsyncadd (%p4485_p11), [#allocation3], 4294967168 }
  0x8a   : > { %3807 = dma.done.wait (%p4486_p6), [#allocation6], 5248   ;;  %p4487_p10 = pmov %p4484_p0 }
  0x8b   : > { %p4488_p5 = pmov %p4484_p0 }
  0x8c   : > { %3809 = vsyncadd (%p4487_p10), [#allocation6], 4294962048 }
  0x8d   : > { %3811 = dma.done.wait (%p4488_p5), [#allocation9], 16384   ;;  %p4489_p3 = pmov %p4484_p0 }
  0x8e   : > { %s335_s2 = sand.u32 1, %s3914_s28   ;;  %s4082_s24 = sand.u32 1, %s3828_s25  }
  0x8f   : > { %3813 = vsyncadd (%p4489_p3), [#allocation9], 4294950912  ;;  %s2993_s15 = sshll.u32 %s4082_s24, 10  ;;  %s336_s19 = scalar_lea.sflag [#allocation3], %s335_s2 }
  0x90   : > { %s4085_s22 = scalar_lea.vmem [#allocation10], %s2993_s15  ;;  %p4490_p1 = scmp.ne.s32.totalorder %s4472_s12, 0 }
  0x92   : > { %3815 = dma.done.wait (%p4490_p1), %s336_s19, 16512  }
  0x93   : > { %3817 = vsyncadd (%p4490_p1), %s336_s19, 4294950784  ;;  %v419_v0 = vld [vmem:[%s4450_s1 + $0xf8] sm:$0xff]  ;;  %v418_v2 = vld [vmem:[%s4450_s1 + $0xf0] sm:$0xff]  ;;  %vm579_vm0 = vcmask 1043456   ;;  %v3851_v45 = vmov 0.0   ;;  %vm575_vm1 = vcmask 293888  }
  0x94   : > { %v403_v1 = vld [vmem:[%s4450_s1 + $0x78] sm:$0xff]  ;;  %3272 = vmatprep.subr.mxu0 %v419_v0  ;;  %v402_v3 = vld [vmem:[%s4450_s1 + $0x70] sm:$0xff]  ;;  %v417_v4 = vld [vmem:[%s4450_s1 + $0xe8] sm:$0xff]  ;;  %668 = vmatprep.mubr.f32.mxu1 %v3851_v45  ;;  %s2995_s14 = sshll.u32 %s4082_s24, 5  ;;  %s3271_s9 = sshll.u32 %s3914_s28, 9 }
  0x95   : > { %3273 = vmatpush3.msra.mxu0 %v403_v1  ;;  %v401_v5 = vld [vmem:[%s4450_s1 + $0x68] sm:$0xff]  ;;  %v416_v6 = vld [vmem:[%s4450_s1 + $0xe0] sm:$0xff]  ;;  %v415_v8 = vld [vmem:[%s4450_s1 + $0xd8] sm:$0xff]  ;;  %s383_s29 = scalar_lea.vmem [#allocation12], %s2995_s14  ;;  %s4407_s19 = scalar_lea.hbm %s4456_s7, %s3271_s9 }
  0x96   : > { %3274 = vmatprep.subr.mxu0 %v418_v2  ;;  %v400_v7 = vld [vmem:[%s4450_s1 + $0x60] sm:$0xff]  ;;  %v399_v9 = vld [vmem:[%s4450_s1 + $0x58] sm:$0xff]  ;;  %v414_v10 = vld [vmem:[%s4450_s1 + $0xd0] sm:$0xff]  ;;  %s2847_s0 = sshll.u32 %s383_s29, 4  ;;  %s2833_s28 = scalar_lea.sflag [#allocation4], %s4082_s24  ;;  %s4409_s0 = int_to_ptr.vmem [resolvable:$true] %s2847_s0 }
  0x97   : > { %3275 = vmatpush3.msra.mxu0 %v402_v3  ;;  %v398_v11 = vld [vmem:[%s4450_s1 + $0x50] sm:$0xff]  ;;  %v413_v12 = vld [vmem:[%s4450_s1 + $0xc8] sm:$0xff]  ;;  %v412_v14 = vld [vmem:[%s4450_s1 + $0xc0] sm:$0xff]  ;;  %s3760_s21 = scalar_lea.vmem %s4409_s0, 512  ;;  %p4491_p7 = scmp.ne.s32.totalorder %s4473_s13, 0 }
  0x98   : > { %3276 = vmatprep.subr.mxu0 %v417_v4  ;;  %v397_v13 = vld [vmem:[%s4450_s1 + $0x48] sm:$0xff]  ;;  %v387_v15 = vld [vmem:[#allocation2] sm:$0xff]  ;;  %v526_v18 = vld [vmem:[#allocation5 + $0x108] sm:$0xf]  ;;  %p3761_p13 = scmp.ne.s32.totalorder %s4409_s0, %s3760_s21  ;;  %s3852_s11 = smov [#allocation12]  }
  0x99   : > { %3277 = vmatpush3.msra.mxu0 %v401_v5  ;;  %v396_v16 = vld [vmem:[%s4450_s1 + $0x40] sm:$0xff]  ;;  %v421_v17 = vcombine.high %v387_v15, %v387_v15  ;;  %v525_v19 = vld [vmem:[#allocation5 + $0x100] sm:$0xf]  ;;  %v411_v20 = vld [vmem:[%s4450_s1 + $0xb8] sm:$0xff]  ;;  %2996 = vmatprep.subr.msk.mxu1 %vm579_vm0, %v526_v18  ;;  %s3764_s16 = sshll.u32 %s3852_s11, 4  ;;  %s3765_s16 = int_to_ptr.vmem [resolvable:$false] %s3764_s16 }
  0x9a   : > { %3278 = vmatprep.subr.mxu0 %v416_v6  ;;  %v518_v21 = vld [vmem:[#allocation5 + $0xc8] sm:$0xff]  ;;  %v517_v22 = vld [vmem:[#allocation5 + $0xc0] sm:$0xff]  ;;  %v395_v24 = vld [vmem:[%s4450_s1 + $0x38] sm:$0xff]  ;;  %2997 = vmatpush1.msk.msra.mxu1 %vm579_vm0, %v525_v19  ;;  %p3762_p2 = pnand %p3761_p13, %p4491_p7  ;;  %s3766_s8 = scalar_lea.vmem %s3765_s16, 1024 }
  0x9b   : > { %3279 = vmatpush3.msra.mxu0 %v400_v7  ;;  %v510_v23 = vld [vmem:[#allocation5 + $0x88] sm:$0xff]  ;;  %487 = vmatprep.mubr.f32.mxu0 %v421_v17  ;;  %v509_v25 = vld [vmem:[#allocation5 + $0x80] sm:$0xff]  ;;  %v408_v30 = vld [vmem:[%s4450_s1 + $0xa0] sm:$0xff]  ;;  %p3767_p9 = scmp.lt.s32.totalorder %s4409_s0, %s3765_s16  ;;  %p3768_p4 = scmp.lt.s32.totalorder %s3766_s8, %s3760_s21 }
  0x9c   : > { %3280 = vmatprep.subr.mxu0 %v415_v8  ;;  %v410_v26 = vld [vmem:[%s4450_s1 + $0xb0] sm:$0xff]  ;;  %628 = vmatprep.subr.mxu1 %v518_v21  ;;  %v409_v28 = vld [vmem:[%s4450_s1 + $0xa8] sm:$0xff]  ;;  %v392_v31 = vld [vmem:[%s4450_s1 + $0x20] sm:$0xff]  ;;  %p3763_p8 = pneg %p3762_p2 }
  0x9d   : > { %3281 = vmatpush3.msra.mxu0 %v399_v9  ;;  %v394_v27 = vld [vmem:[%s4450_s1 + $0x30] sm:$0xff]  ;;  %629 = vmatpush1.msra.mxu1 %v517_v22  ;;  %v393_v29 = vld [vmem:[%s4450_s1 + $0x28] sm:$0xff]  ;;  %v407_v32 = vld [vmem:[%s4450_s1 + $0x98] sm:$0xff]  ;;  %p3769_p12 = por %p3768_p4, %p3767_p9 }
  0x9e   : > { %3282 = vmatprep.subr.mxu0 %v414_v10  ;;  %630 = vmatprep.subr.mxu1 %v510_v23  ;;  %v391_v33 = vld [vmem:[%s4450_s1 + $0x18] sm:$0xff]  ;;  %v406_v34 = vld [vmem:[%s4450_s1 + $0x90] sm:$0xff]  ;;  %v405_v36 = vld [vmem:[%s4450_s1 + $0x88] sm:$0xff] }
  0x9f   : > { %3283 = vmatpush3.msra.mxu0 %v398_v11  ;;  %631 = vmatpush1.msra.mxu1 %v509_v25  ;;  %v390_v35 = vld [vmem:[%s4450_s1 + $0x10] sm:$0xff]  ;;  %v389_v37 = vld [vmem:[%s4450_s1 + $0x8] sm:$0xff]  ;;  %v404_v38 = vld [vmem:[%s4450_s1 + $0x80] sm:$0xff]  ;;  %p3770_p0 = pnand %p3769_p12, %p3763_p8 }
  0xa0   : > { %3284 = vmatprep.subr.mxu0 %v413_v12  ;;  %v388_v39 = vld [vmem:[%s4450_s1] sm:$0xff]  ;;  %v502_v40 = vld [vmem:[#allocation5 + $0x48] sm:$0xff]  ;;  %v501_v41 = vld [vmem:[#allocation5 + $0x40] sm:$0xff] }
  0xa1   : > { %3285 = vmatpush3.msra.mxu0 %v397_v13  ;;  %632 = vmatprep.subr.mxu1 %v502_v40  ;;  %v494_v42 = vld [vmem:[#allocation5 + $0x8] sm:$0xff]  ;;  %v493_v43 = vld [vmem:[#allocation5] sm:$0xff]  ;;  %v528_v44 = vld [vmem:[#allocation5 + $0x118] sm:$0xf] }
  0xa2   : > { %3286 = vmatprep.subr.mxu0 %v412_v14  ;;  %633 = vmatpush1.msra.mxu1 %v501_v41  ;;  %v3408_v46 = vld [vmem:[#allocation8 + $0x70] ss:$8 sps:$4 sm:$0xff]   ;;  %v3410_v47 = vld [vmem:[#allocation8 + $0x74] ss:$8 sps:$4 sm:$0xff]   ;;  %v3413_v48 = vld [vmem:[#allocation8 + $0x64] ss:$8 sps:$4 sm:$0xff]  }
  0xa3   : > { %3287 = vmatpush3.msra.mxu0 %v396_v16  ;;  %634 = vmatprep.subr.mxu1 %v494_v42  ;;  %v3411_v49 = vld [vmem:[#allocation8 + $0x60] ss:$8 sps:$4 sm:$0xff]   ;;  %v3416_v50 = vld [vmem:[#allocation8 + $0x54] ss:$8 sps:$4 sm:$0xff]   ;;  %v3414_v51 = vld [vmem:[#allocation8 + $0x50] ss:$8 sps:$4 sm:$0xff]  }
  0xa4   : > { %3288 = vmatprep.subr.mxu0 %v411_v20  ;;  %635 = vmatpush1.msra.mxu1 %v493_v43  ;;  %v3422_v52 = vld [vmem:[#allocation8 + $0x44] ss:$8 sps:$4 sm:$0xff]   ;;  %v3420_v53 = vld [vmem:[#allocation8 + $0x40] ss:$8 sps:$4 sm:$0xff]   ;;  %v3428_v54 = vld [vmem:[#allocation8 + $0x34] ss:$8 sps:$4 sm:$0xff]  }
  0xa5   : > { %3289 = vmatpush3.msra.mxu0 %v395_v24  ;;  %2999 = vmatprep.subr.msk.mxu1 %vm579_vm0, %v528_v44  ;;  %v3426_v55 = vld [vmem:[#allocation8 + $0x30] ss:$8 sps:$4 sm:$0xff]   ;;  %v3434_v56 = vld [vmem:[#allocation8 + $0x24] ss:$8 sps:$4 sm:$0xff]   ;;  %v3432_v57 = vld [vmem:[#allocation8 + $0x20] ss:$8 sps:$4 sm:$0xff]  }
  0xa6   : > { %3290 = vmatprep.subr.mxu0 %v410_v26  ;;  %v3440_v58 = vld [vmem:[#allocation8 + $0x14] ss:$8 sps:$4 sm:$0xff]   ;;  %v3438_v59 = vld [vmem:[#allocation8 + $0x10] ss:$8 sps:$4 sm:$0xff]   ;;  %v3446_v60 = vld [vmem:[#allocation8 + $0x4] ss:$8 sps:$4 sm:$0xff]  }
  0xa7   : > { %3291 = vmatpush3.msra.mxu0 %v394_v27  ;;  %v3444_v61 = vld [vmem:[#allocation8] ss:$8 sps:$4 sm:$0xff]   ;;  %v3452_v62 = vld [vmem:[#allocation8 + $0xf4] ss:$8 sps:$4 sm:$0xff]   ;;  %v3450_v63 = vld [vmem:[#allocation8 + $0xf0] ss:$8 sps:$4 sm:$0xff]  }
  0xa8   : > { %3292 = vmatprep.subr.mxu0 %v409_v28  ;;  %v3458_v0 = vld [vmem:[#allocation8 + $0xe4] ss:$8 sps:$4 sm:$0xff]   ;;  %v3456_v1 = vld [vmem:[#allocation8 + $0xe0] ss:$8 sps:$4 sm:$0xff]   ;;  %v3464_v2 = vld [vmem:[#allocation8 + $0xd4] ss:$8 sps:$4 sm:$0xff]  }
  0xa9   : > { %3293 = vmatpush3.msra.mxu0 %v393_v29  ;;  %v3462_v3 = vld [vmem:[#allocation8 + $0xd0] ss:$8 sps:$4 sm:$0xff]   ;;  %v3470_v4 = vld [vmem:[#allocation8 + $0xc4] ss:$8 sps:$4 sm:$0xff]   ;;  %v3468_v5 = vld [vmem:[#allocation8 + $0xc0] ss:$8 sps:$4 sm:$0xff]  }
  0xaa   : > { %3294 = vmatprep.subr.mxu0 %v408_v30  ;;  %v3476_v6 = vld [vmem:[#allocation8 + $0xb4] ss:$8 sps:$4 sm:$0xff]   ;;  %v3474_v7 = vld [vmem:[#allocation8 + $0xb0] ss:$8 sps:$4 sm:$0xff]   ;;  %v3482_v8 = vld [vmem:[#allocation8 + $0xa4] ss:$8 sps:$4 sm:$0xff]  }
  0xab   : > { %3295 = vmatpush3.msra.mxu0 %v392_v31  ;;  %v3480_v9 = vld [vmem:[#allocation8 + $0xa0] ss:$8 sps:$4 sm:$0xff]   ;;  %v520_v14 = vld [vmem:[#allocation5 + $0xd8] sm:$0xff]  ;;  %v529_v23 = vld [vmem:[#allocation5 + $0x120] sm:$0xf] }
  0xac   : > { %3296 = vmatprep.subr.mxu0 %v407_v32  ;;  %v527_v13 = vld [vmem:[#allocation5 + $0x110] sm:$0xf]  ;;  %v512_v16 = vld [vmem:[#allocation5 + $0x98] sm:$0xff]  ;;  %v530_v22 = vld [vmem:[#allocation5 + $0x128] sm:$0xf] }
  0xad   : > { %3297 = vmatpush3.msra.mxu0 %v391_v33  ;;  %v511_v17 = vld [vmem:[#allocation5 + $0x90] sm:$0xff]  ;;  %v504_v18 = vld [vmem:[#allocation5 + $0x58] sm:$0xff]  ;;  %v522_v24 = vld [vmem:[#allocation5 + $0xe8] sm:$0xff] }
  0xae   : > { %3298 = vmatprep.subr.mxu0 %v406_v34  ;;  %v503_v19 = vld [vmem:[#allocation5 + $0x50] sm:$0xff]  ;;  %v496_v20 = vld [vmem:[#allocation5 + $0x18] sm:$0xff]  ;;  %v521_v25 = vld [vmem:[#allocation5 + $0xe0] sm:$0xff] }
  0xaf   : > { %3299 = vmatpush3.msra.mxu0 %v390_v35  ;;  %v495_v21 = vld [vmem:[#allocation5 + $0x10] sm:$0xff]  ;;  %v514_v26 = vld [vmem:[#allocation5 + $0xa8] sm:$0xff]  ;;  %v513_v27 = vld [vmem:[#allocation5 + $0xa0] sm:$0xff] }
  0xb0   : > { %3300 = vmatprep.subr.mxu0 %v405_v36  ;;  %v506_v28 = vld [vmem:[#allocation5 + $0x68] sm:$0xff]  ;;  %v505_v29 = vld [vmem:[#allocation5 + $0x60] sm:$0xff]  ;;  %v532_v32 = vld [vmem:[#allocation5 + $0x138] sm:$0xf] }
  0xb1   : > { %3301 = vmatpush3.msra.mxu0 %v389_v37  ;;  %v498_v30 = vld [vmem:[#allocation5 + $0x28] sm:$0xff]  ;;  %v497_v31 = vld [vmem:[#allocation5 + $0x20] sm:$0xff]  ;;  %v531_v33 = vld [vmem:[#allocation5 + $0x130] sm:$0xf] }
  0xb2   : > { %3302 = vmatprep.subr.mxu0 %v404_v38  ;;  %v524_v34 = vld [vmem:[#allocation5 + $0xf8] sm:$0xff]  ;;  %v523_v35 = vld [vmem:[#allocation5 + $0xf0] sm:$0xff] }
  0xb3   : > { %3303 = vmatpush3.msra.mxu0 %v388_v39  ;;  %v516_v36 = vld [vmem:[#allocation5 + $0xb8] sm:$0xff]  ;;  %v515_v37 = vld [vmem:[#allocation5 + $0xb0] sm:$0xff] }
  0xb4   : > { %488 = vmatmul.mubr.f32.vlgmr.msra.gmra.mxu0 %v387_v15  ;;  %1672 = vmatprep.subr.bf16.mxu0 %v3410_v47  ;;  %v519_v15 = vld [vmem:[#allocation5 + $0xd0] sm:$0xff]  ;;  %v508_v38 = vld [vmem:[#allocation5 + $0x78] sm:$0xff] }
  0xb5   : > { %1673 = vmatpush1.bf16.msra.mxu0 %v3408_v46  ;;  %v507_v39 = vld [vmem:[#allocation5 + $0x70] sm:$0xff]  ;;  %v500_v40 = vld [vmem:[#allocation5 + $0x38] sm:$0xff] }
  0xb6   : > { %1674 = vmatprep.subr.bf16.mxu0 %v3413_v48  ;;  %v499_v41 = vld [vmem:[#allocation5 + $0x30] sm:$0xff]  ;;  %v3419_v42 = vld [vmem:[#allocation8 + $0x174] ss:$8 sps:$4 sm:$0xff]   ;;  %v3417_v43 = vld [vmem:[#allocation8 + $0x170] ss:$8 sps:$4 sm:$0xff]  }
  0xb7   : > { %v3425_v44 = vld [vmem:[#allocation8 + $0x164] ss:$8 sps:$4 sm:$0xff]   ;;  %v3431_v46 = vld [vmem:[#allocation8 + $0x154] ss:$8 sps:$4 sm:$0xff]   ;;  %v3429_v47 = vld [vmem:[#allocation8 + $0x150] ss:$8 sps:$4 sm:$0xff]  }
  0xb8   : > { %v3437_v48 = vld [vmem:[#allocation8 + $0x144] ss:$8 sps:$4 sm:$0xff]  }
  0xb9   : > { %1675 = vmatpush1.bf16.msra.mxu0 %v3411_v49  ;;  %v3435_v49 = vld [vmem:[#allocation8 + $0x140] ss:$8 sps:$4 sm:$0xff]  }
  0xba   : > { %1676 = vmatprep.subr.bf16.mxu0 %v3416_v50  ;;  %v3443_v50 = vld [vmem:[#allocation8 + $0x134] ss:$8 sps:$4 sm:$0xff]  }
  0xbd   : > { %1677 = vmatpush1.bf16.msra.mxu0 %v3414_v51  ;;  %v3441_v51 = vld [vmem:[#allocation8 + $0x130] ss:$8 sps:$4 sm:$0xff]  }
  0xbe   : > { %1678 = vmatprep.subr.bf16.mxu0 %v3422_v52  ;;  %v3449_v52 = vld [vmem:[#allocation8 + $0x124] ss:$8 sps:$4 sm:$0xff]  }
  0xc1   : > { %1679 = vmatpush1.bf16.msra.mxu0 %v3420_v53  ;;  %v3447_v53 = vld [vmem:[#allocation8 + $0x120] ss:$8 sps:$4 sm:$0xff]  }
  0xc2   : > { %1680 = vmatprep.subr.bf16.mxu0 %v3428_v54  ;;  %v3455_v54 = vld [vmem:[#allocation8 + $0x114] ss:$8 sps:$4 sm:$0xff]  }
  0xc5   : > { %1681 = vmatpush1.bf16.msra.mxu0 %v3426_v55  ;;  %v3453_v55 = vld [vmem:[#allocation8 + $0x110] ss:$8 sps:$4 sm:$0xff]  }
  0xc6   : > { %1682 = vmatprep.subr.bf16.mxu0 %v3434_v56  ;;  %v3461_v56 = vld [vmem:[#allocation8 + $0x104] ss:$8 sps:$4 sm:$0xff]  }
  0xc9   : > { %1683 = vmatpush1.bf16.msra.mxu0 %v3432_v57  ;;  %v3459_v57 = vld [vmem:[#allocation8 + $0x100] ss:$8 sps:$4 sm:$0xff]  }
  0xca   : > { %1684 = vmatprep.subr.bf16.mxu0 %v3440_v58  ;;  %v3467_v58 = vld [vmem:[#allocation8 + $0x1f4] ss:$8 sps:$4 sm:$0xff]  }
  0xcd   : > { %1685 = vmatpush1.bf16.msra.mxu0 %v3438_v59  ;;  %v3465_v59 = vld [vmem:[#allocation8 + $0x1f0] ss:$8 sps:$4 sm:$0xff]  }
  0xce   : > { %1686 = vmatprep.subr.bf16.mxu0 %v3446_v60  ;;  %v3473_v60 = vld [vmem:[#allocation8 + $0x1e4] ss:$8 sps:$4 sm:$0xff]  }
  0xd1   : > { %1687 = vmatpush1.bf16.msra.mxu0 %v3444_v61  ;;  %v3471_v61 = vld [vmem:[#allocation8 + $0x1e0] ss:$8 sps:$4 sm:$0xff]  }
  0xd2   : > { %1688 = vmatprep.subr.bf16.mxu0 %v3452_v62  ;;  %v3479_v62 = vld [vmem:[#allocation8 + $0x1d4] ss:$8 sps:$4 sm:$0xff]  }
  0xd5   : > { %1689 = vmatpush2.bf16.msra.mxu0 %v3450_v63  ;;  %v3488_v63 = vld [vmem:[#allocation8 + $0x94] ss:$8 sps:$4 sm:$0xff]  }
  0xd6   : > { %1690 = vmatprep.subr.bf16.mxu0 %v3458_v0  ;;  %v3486_v0 = vld [vmem:[#allocation8 + $0x90] ss:$8 sps:$4 sm:$0xff]  }
  0xd9   : > { %1691 = vmatpush2.bf16.msra.mxu0 %v3456_v1  ;;  %v3477_v1 = vld [vmem:[#allocation8 + $0x1d0] ss:$8 sps:$4 sm:$0xff]  }
  0xda   : > { %1692 = vmatprep.subr.bf16.mxu0 %v3464_v2  ;;  %v3485_v2 = vld [vmem:[#allocation8 + $0x1c4] ss:$8 sps:$4 sm:$0xff]  }
  0xdd   : > { %1693 = vmatpush2.bf16.msra.mxu0 %v3462_v3  ;;  %v3494_v3 = vld [vmem:[#allocation8 + $0x84] ss:$8 sps:$4 sm:$0xff]  }
  0xde   : > { %1694 = vmatprep.subr.bf16.mxu0 %v3470_v4  ;;  %v3492_v4 = vld [vmem:[#allocation8 + $0x80] ss:$8 sps:$4 sm:$0xff]  }
  0xe1   : > { %1695 = vmatpush2.bf16.msra.mxu0 %v3468_v5  ;;  %v3483_v5 = vld [vmem:[#allocation8 + $0x1c0] ss:$8 sps:$4 sm:$0xff]  }
  0xe2   : > { %1696 = vmatprep.subr.bf16.mxu0 %v3476_v6  ;;  %v3491_v6 = vld [vmem:[#allocation8 + $0x1b4] ss:$8 sps:$4 sm:$0xff]  }
  0xe5   : > { %1697 = vmatpush2.bf16.msra.mxu0 %v3474_v7  ;;  %v3500_v7 = vld [vmem:[#allocation8 + $0x274] ss:$8 sps:$4 sm:$0xff]  }
  0xe6   : > { %1698 = vmatprep.subr.bf16.mxu0 %v3482_v8  ;;  %v3489_v8 = vld [vmem:[#allocation8 + $0x1b0] ss:$8 sps:$4 sm:$0xff]  }
  0xe9   : > { %1699 = vmatpush2.bf16.msra.mxu0 %v3480_v9  ;;  %v3497_v9 = vld [vmem:[#allocation8 + $0x1a4] ss:$8 sps:$4 sm:$0xff]  }
  0xea   : > { %1700 = vmatprep.subr.bf16.mxu0 %v3488_v63  ;;  %v3525_v63 = vld [vmem:[#allocation8 + $0x350] ss:$8 sps:$4 sm:$0xff]  }
  0xed   : > { %1701 = vmatpush2.bf16.msra.mxu0 %v3486_v0 }
  0xee   : > { %1702 = vmatprep.subr.bf16.mxu0 %v3494_v3  ;;  %v3528_v3 = vld [vmem:[#allocation8 + $0x220] ss:$8 sps:$4 sm:$0xff]  }
  0xf1   : > { %1703 = vmatpush2.bf16.msra.mxu0 %v3492_v4  ;;  %v3536_v4 = vld [vmem:[#allocation8 + $0x214] ss:$8 sps:$4 sm:$0xff]  }
  0xf2   : > { %1754 = vmatprep.subr.bf16.mxu0 %v3500_v7 }
 0x174   : > { %v3304_v10 = vpop.f32.mrf.mxu0 }
 0x176   : > { %v3305_v11 = vpop.f32.mrf.mxu0 }
 0x177   : > { %v4191_v12 = vadd.f32 %v3305_v11, %v3304_v10  ;;  %v3495_v10 = vld [vmem:[#allocation8 + $0x1a0] ss:$8 sps:$4 sm:$0xff]   ;;  %v3503_v11 = vld [vmem:[#allocation8 + $0x194] ss:$8 sps:$4 sm:$0xff]  }
 0x179   : > { %2998 = vmatmul.mubr.msk.f32.vlgmr.msra.gmra.mxu1 %vm575_vm1, %v4191_v12 }
 0x17a   : > { %3000 = vmatpush1.msk.msra.mxu1 %vm579_vm0, %v527_v13  ;;  %739 = vmatprep.mubr.f32.mxu1 %v3851_v45  ;;  %v3509_v13 = vld [vmem:[#allocation8 + $0x184] ss:$8 sps:$4 sm:$0xff]  }
 0x17b   : > { %699 = vmatprep.subr.mxu1 %v520_v14  ;;  %v3507_v14 = vld [vmem:[#allocation8 + $0x180] ss:$8 sps:$4 sm:$0xff]  }
 0x17c   : > { %700 = vmatpush1.msra.mxu1 %v519_v15  ;;  %v3515_v15 = vld [vmem:[#allocation8 + $0x374] ss:$8 sps:$4 sm:$0xff]  }
 0x17d   : > { %701 = vmatprep.subr.mxu1 %v512_v16  ;;  %v535_v16 = vlaneseq }
 0x17e   : > { %702 = vmatpush1.msra.mxu1 %v511_v17 }
 0x17f   : > { %703 = vmatprep.subr.mxu1 %v504_v18  ;;  %v4209_v17 = vshrl.u32 %v535_v16, 7  ;;  %v3540_v16 = vld [vmem:[#allocation8 + $0x200] ss:$8 sps:$4 sm:$0xff]  }
 0x180   : > { %704 = vmatpush1.msra.mxu1 %v503_v19  ;;  %v4212_v19 = vld [vmem:[#allocation7] sm:$0xff] }
 0x181   : > { %705 = vmatprep.subr.mxu1 %v496_v20  ;;  %v537_v18 = vsub.s32 0, %v4209_v17  ;;  %v541_v20 = vsub.s32 1, %v4209_v17  ;;  %v565_v0 = vsub.s32 7, %v4209_v17 }
 0x182   : > { %706 = vmatpush1.msra.mxu1 %v495_v21 }
 0x183   : > { %3001 = vmatmul.mubr.msk.f32.vlgmr.msra.gmra.mxu1 %vm575_vm1, %v4191_v12  ;;  %3002 = vmatprep.subr.msk.mxu1 %vm579_vm0, %v530_v22  ;;  %v538_v21 = vrot.slane %v4212_v19, %v537_v18  ;;  %v542_v22 = vrot.slane %v4212_v19, %v541_v20 }
 0x184   : > { %3003 = vmatpush1.msk.msra.mxu1 %vm579_vm0, %v529_v23  ;;  %810 = vmatprep.mubr.f32.mxu1 %v3851_v45 }
 0x185   : > { %770 = vmatprep.subr.mxu1 %v522_v24 }
 0x186   : > { %771 = vmatpush1.msra.mxu1 %v521_v25 }
 0x187   : > { %772 = vmatprep.subr.mxu1 %v514_v26 }
 0x188   : > { %773 = vmatpush1.msra.mxu1 %v513_v27  ;;  %v545_v27 = vsub.s32 2, %v4209_v17 }
 0x189   : > { %774 = vmatprep.subr.mxu1 %v506_v28 }
 0x18a   : > { %775 = vmatpush1.msra.mxu1 %v505_v29 }
 0x18b   : > { %776 = vmatprep.subr.mxu1 %v498_v30  ;;  %v549_v30 = vsub.s32 3, %v4209_v17 }
 0x18c   : > { %777 = vmatpush1.msra.mxu1 %v497_v31 }
 0x18d   : > { %3004 = vmatmul.mubr.msk.f32.vlgmr.msra.gmra.mxu1 %vm575_vm1, %v4191_v12  ;;  %3005 = vmatprep.subr.msk.mxu1 %vm579_vm0, %v532_v32  ;;  %v546_v32 = vrot.slane %v4212_v19, %v545_v27 }
 0x18e   : > { %3006 = vmatpush1.msk.msra.mxu1 %vm579_vm0, %v531_v33  ;;  %881 = vmatprep.mubr.f32.mxu1 %v3851_v45  ;;  %v3423_v45 = vld [vmem:[#allocation8 + $0x160] ss:$8 sps:$4 sm:$0xff]   ;;  %v3498_v33 = vld [vmem:[#allocation8 + $0x270] ss:$8 sps:$4 sm:$0xff]  }
 0x18f   : > { %841 = vmatprep.subr.mxu1 %v524_v34 }
 0x190   : > { %842 = vmatpush1.msra.mxu1 %v523_v35  ;;  %v3506_v35 = vld [vmem:[#allocation8 + $0x264] ss:$8 sps:$4 sm:$0xff]  }
 0x191   : > { %843 = vmatprep.subr.mxu1 %v516_v36  ;;  %v550_v36 = vrot.slane %v4212_v19, %v549_v30 }
 0x192   : > { %844 = vmatpush1.msra.mxu1 %v515_v37 }
 0x193   : > { %845 = vmatprep.subr.mxu1 %v508_v38 }
 0x194   : > { %846 = vmatpush1.msra.mxu1 %v507_v39  ;;  %v3504_v39 = vld [vmem:[#allocation8 + $0x260] ss:$8 sps:$4 sm:$0xff]  }
 0x195   : > { %847 = vmatprep.subr.mxu1 %v500_v40 }
 0x196   : > { %848 = vmatpush1.msra.mxu1 %v499_v41  ;;  %v3512_v41 = vld [vmem:[#allocation8 + $0x254] ss:$8 sps:$4 sm:$0xff]  }
 0x197   : > { %3007 = vmatmul.mubr.msk.f32.vlgmr.msra.gmra.mxu1 %vm575_vm1, %v4191_v12  ;;  %1713 = vmatprep.subr.bf16.mxu1 %v3419_v42  ;;  %v3501_v12 = vld [vmem:[#allocation8 + $0x190] ss:$8 sps:$4 sm:$0xff]  }
 0x198   : > { %1714 = vmatpush1.bf16.msra.mxu1 %v3417_v43 }
 0x199   : > { %1715 = vmatprep.subr.bf16.mxu1 %v3425_v44 }
 0x19c   : > { %1716 = vmatpush1.bf16.msra.mxu1 %v3423_v45  ;;  %v3510_v45 = vld [vmem:[#allocation8 + $0x250] ss:$8 sps:$4 sm:$0xff]  }
 0x19d   : > { %1717 = vmatprep.subr.bf16.mxu1 %v3431_v46  ;;  %v557_v46 = vsub.s32 5, %v4209_v17 }
 0x1a0   : > { %1718 = vmatpush1.bf16.msra.mxu1 %v3429_v47  ;;  %v3518_v47 = vld [vmem:[#allocation8 + $0x244] ss:$8 sps:$4 sm:$0xff]  }
 0x1a1   : > { %1719 = vmatprep.subr.bf16.mxu1 %v3437_v48 }
 0x1a4   : > { %1720 = vmatpush1.bf16.msra.mxu1 %v3435_v49  ;;  %v3513_v49 = vld [vmem:[#allocation8 + $0x370] ss:$8 sps:$4 sm:$0xff]  }
 0x1a5   : > { %1721 = vmatprep.subr.bf16.mxu1 %v3443_v50 }
 0x1a8   : > { %1722 = vmatpush1.bf16.msra.mxu1 %v3441_v51  ;;  %v3521_v51 = vld [vmem:[#allocation8 + $0x364] ss:$8 sps:$4 sm:$0xff]  }
 0x1a9   : > { %1723 = vmatprep.subr.bf16.mxu1 %v3449_v52  ;;  %v558_v52 = vrot.slane %v4212_v19, %v557_v46 }
 0x1ac   : > { %1724 = vmatpush1.bf16.msra.mxu1 %v3447_v53  ;;  %v3516_v53 = vld [vmem:[#allocation8 + $0x240] ss:$8 sps:$4 sm:$0xff]  }
 0x1ad   : > { %1725 = vmatprep.subr.bf16.mxu1 %v3455_v54 }
 0x1b0   : > { %1726 = vmatpush1.bf16.msra.mxu1 %v3453_v55  ;;  %v3524_v55 = vld [vmem:[#allocation8 + $0x234] ss:$8 sps:$4 sm:$0xff]  }
 0x1b1   : > { %1727 = vmatprep.subr.bf16.mxu1 %v3461_v56  ;;  %v3519_v56 = vld [vmem:[#allocation8 + $0x360] ss:$8 sps:$4 sm:$0xff]  }
 0x1b4   : > { %1728 = vmatpush1.bf16.msra.mxu1 %v3459_v57 }
 0x1b5   : > { %1729 = vmatprep.subr.bf16.mxu1 %v3467_v58  ;;  %v3527_v58 = vld [vmem:[#allocation8 + $0x354] ss:$8 sps:$4 sm:$0xff]  }
 0x1b8   : > { %1730 = vmatpush2.bf16.msra.mxu1 %v3465_v59 }
 0x1b9   : > { %1731 = vmatprep.subr.bf16.mxu1 %v3473_v60  ;;  %v3522_v60 = vld [vmem:[#allocation8 + $0x230] ss:$8 sps:$4 sm:$0xff]  }
 0x1bc   : > { %1732 = vmatpush2.bf16.msra.mxu1 %v3471_v61  ;;  %v3530_v61 = vld [vmem:[#allocation8 + $0x224] ss:$8 sps:$4 sm:$0xff]  }
 0x1bd   : > { %1733 = vmatprep.subr.bf16.mxu1 %v3479_v62 }
 0x1c0   : > { %1734 = vmatpush2.bf16.msra.mxu1 %v3477_v1  ;;  %v3533_v1 = vld [vmem:[#allocation8 + $0x344] ss:$8 sps:$4 sm:$0xff]  }
 0x1c1   : > { %1735 = vmatprep.subr.bf16.mxu1 %v3485_v2 }
 0x1c4   : > { %1736 = vmatpush2.bf16.msra.mxu1 %v3483_v5  ;;  %v3531_v5 = vld [vmem:[#allocation8 + $0x340] ss:$8 sps:$4 sm:$0xff]  }
 0x1c5   : > { %1737 = vmatprep.subr.bf16.mxu1 %v3491_v6  ;;  %v566_v6 = vrot.slane %v4212_v19, %v565_v0 }
 0x1c8   : > { %1738 = vmatpush2.bf16.msra.mxu1 %v3489_v8  ;;  %v3539_v8 = vld [vmem:[#allocation8 + $0x334] ss:$8 sps:$4 sm:$0xff]  }
 0x1c9   : > { %1739 = vmatprep.subr.bf16.mxu1 %v3497_v9  ;;  %v3534_v9 = vld [vmem:[#allocation8 + $0x210] ss:$8 sps:$4 sm:$0xff]  }
 0x1cc   : > { %1740 = vmatpush2.bf16.msra.mxu1 %v3495_v10 }
 0x1cd   : > { %1741 = vmatprep.subr.bf16.mxu1 %v3503_v11  ;;  %v3542_v11 = vld [vmem:[#allocation8 + $0x204] ss:$8 sps:$4 sm:$0xff]  }
 0x1d0   : > { %1742 = vmatpush2.bf16.msra.mxu1 %v3501_v12 }
 0x1d1   : > { %1743 = vmatprep.subr.bf16.mxu1 %v3509_v13  ;;  %v3537_v13 = vld [vmem:[#allocation8 + $0x330] ss:$8 sps:$4 sm:$0xff]  }
 0x1d4   : > { %1744 = vmatpush2.bf16.msra.mxu1 %v3507_v14  ;;  %v3545_v14 = vld [vmem:[#allocation8 + $0x324] ss:$8 sps:$4 sm:$0xff]  }
 0x1d5   : > { %1795 = vmatprep.subr.bf16.mxu1 %v3515_v15 }
 0x239   : > { %v670_v23 = vpop.f32.mrf.mxu1 }
 0x23a   : > { %v671_v24 = vadd.f32 %v670_v23, %v538_v21  ;;  %v3548_v21 = vld [vmem:[#allocation8 + $0x2f4] ss:$8 sps:$4 sm:$0xff]   ;;  %v3543_v23 = vld [vmem:[#allocation8 + $0x320] ss:$8 sps:$4 sm:$0xff]  }
 0x23b   : > { %v672_v25 = vpop.f32.mrf.mxu1 }
 0x23c   : > { %v673_v26 = vadd.f32 %v672_v25, %v542_v22  ;;  %v888_v28 = vmax.f32 %v671_v24, 0.0  ;;  %v3551_v24 = vld [vmem:[#allocation8 + $0x314] ss:$8 sps:$4 sm:$0xff]   ;;  %v3546_v25 = vld [vmem:[#allocation8 + $0x2f0] ss:$8 sps:$4 sm:$0xff]  }
 0x23e   : > { %v889_v29 = vmax.f32 %v673_v26, 0.0  ;;  %v896_v34 = vpack.c.bf16 %v888_v28, %v888_v28  ;;  %v3554_v26 = vld [vmem:[#allocation8 + $0x2e4] ss:$8 sps:$4 sm:$0xff]   ;;  %v3549_v28 = vld [vmem:[#allocation8 + $0x310] ss:$8 sps:$4 sm:$0xff]  }
 0x240   : > { %v897_v31 = vpack.c.bf16 %v889_v29, %v889_v29  ;;  %v3557_v29 = vld [vmem:[#allocation8 + $0x304] ss:$8 sps:$4 sm:$0xff]  }
 0x242   : > { %1704 = vmatprep.mubr.bf16.mxu0 %v897_v31  ;;  %v3552_v31 = vld [vmem:[#allocation8 + $0x2e0] ss:$8 sps:$4 sm:$0xff]  }
 0x243   : > { %v741_v37 = vpop.f32.mrf.mxu1  ;;  %1705 = vmatmul.mubr.bf16.vlgmr.msra.gmra.mxu0 %v896_v34  ;;  %v3563_v34 = vld [vmem:[#allocation8 + $0x3f4] ss:$8 sps:$4 sm:$0xff]  }
 0x244   : > { %v742_v38 = vadd.f32 %v741_v37, %v546_v32  ;;  %1755 = vmatpush1.bf16.msra.mxu0 %v3498_v33  ;;  %v3560_v32 = vld [vmem:[#allocation8 + $0x2d4] ss:$8 sps:$4 sm:$0xff]   ;;  %v3555_v33 = vld [vmem:[#allocation8 + $0x300] ss:$8 sps:$4 sm:$0xff]   ;;  %v3561_v37 = vld [vmem:[#allocation8 + $0x3f0] ss:$8 sps:$4 sm:$0xff]  }
 0x245   : > { %v743_v40 = vpop.f32.mrf.mxu1  ;;  %1756 = vmatprep.subr.bf16.mxu0 %v3506_v35  ;;  %v3558_v35 = vld [vmem:[#allocation8 + $0x2d0] ss:$8 sps:$4 sm:$0xff]  }
 0x246   : > { %v744_v42 = vadd.f32 %v743_v40, %v550_v36  ;;  %v890_v43 = vmax.f32 %v742_v38, 0.0  ;;  %v3566_v36 = vld [vmem:[#allocation8 + $0x2c4] ss:$8 sps:$4 sm:$0xff]   ;;  %v3572_v40 = vld [vmem:[#allocation8 + $0x2b4] ss:$8 sps:$4 sm:$0xff]  }
 0x247   : > { %v3569_v38 = vld [vmem:[#allocation8 + $0x3e4] ss:$8 sps:$4 sm:$0xff]  }
 0x248   : > { %v891_v44 = vmax.f32 %v744_v42, 0.0  ;;  %1757 = vmatpush1.bf16.msra.mxu0 %v3504_v39  ;;  %v898_v50 = vpack.c.bf16 %v890_v43, %v890_v43  ;;  %v3564_v39 = vld [vmem:[#allocation8 + $0x2c0] ss:$8 sps:$4 sm:$0xff]   ;;  %v3575_v42 = vld [vmem:[#allocation8 + $0x3d4] ss:$8 sps:$4 sm:$0xff]  }
 0x249   : > { %1758 = vmatprep.subr.bf16.mxu0 %v3512_v41  ;;  %v3567_v41 = vld [vmem:[#allocation8 + $0x3e0] ss:$8 sps:$4 sm:$0xff]   ;;  %v3570_v43 = vld [vmem:[#allocation8 + $0x2b0] ss:$8 sps:$4 sm:$0xff]  }
 0x24a   : > { %v899_v48 = vpack.c.bf16 %v891_v44, %v891_v44  ;;  %v553_v44 = vsub.s32 4, %v4209_v17 }
 0x24c   : > { %1745 = vmatprep.mubr.bf16.mxu1 %v899_v48  ;;  %1759 = vmatpush1.bf16.msra.mxu0 %v3510_v45  ;;  %v3578_v45 = vld [vmem:[#allocation8 + $0x2a4] ss:$8 sps:$4 sm:$0xff]  }
 0x24d   : > { %v4233_v54 = vpop.f32.mrf.mxu1  ;;  %1746 = vmatmul.mubr.bf16.vlgmr.msra.gmra.mxu1 %v898_v50  ;;  %1760 = vmatprep.subr.bf16.mxu0 %v3518_v47  ;;  %v3573_v47 = vld [vmem:[#allocation8 + $0x3d0] ss:$8 sps:$4 sm:$0xff]   ;;  %v3581_v48 = vld [vmem:[#allocation8 + $0x3c4] ss:$8 sps:$4 sm:$0xff]   ;;  %v554_v50 = vrot.slane %v4212_v19, %v553_v44 }
 0x24e   : > { %1796 = vmatpush1.bf16.msra.mxu1 %v3513_v49  ;;  %v3576_v49 = vld [vmem:[#allocation8 + $0x2a0] ss:$8 sps:$4 sm:$0xff]  }
 0x24f   : > { %v814_v57 = vpop.f32.mrf.mxu1  ;;  %1797 = vmatprep.subr.bf16.mxu1 %v3521_v51  ;;  %v3584_v51 = vld [vmem:[#allocation8 + $0x294] ss:$8 sps:$4 sm:$0xff]  }
 0x250   : > { %v815_v59 = vadd.f32 %v814_v57, %v558_v52  ;;  %1761 = vmatpush1.bf16.msra.mxu0 %v3516_v53  ;;  %v3579_v52 = vld [vmem:[#allocation8 + $0x3c0] ss:$8 sps:$4 sm:$0xff]   ;;  %v3587_v53 = vld [vmem:[#allocation8 + $0x3b4] ss:$8 sps:$4 sm:$0xff]   ;;  %v3590_v57 = vld [vmem:[#allocation8 + $0x284] ss:$8 sps:$4 sm:$0xff]  }
 0x251   : > { %1762 = vmatprep.subr.bf16.mxu0 %v3524_v55  ;;  %v3582_v55 = vld [vmem:[#allocation8 + $0x290] ss:$8 sps:$4 sm:$0xff]  }
 0x252   : > { %v893_v62 = vmax.f32 %v815_v59, 0.0  ;;  %1798 = vmatpush1.bf16.msra.mxu1 %v3519_v56  ;;  %v813_v56 = vadd.f32 %v4233_v54, %v554_v50  ;;  %v561_v59 = vsub.s32 6, %v4209_v17  ;;  %v3596_v54 = vld [vmem:[#allocation8 + $0x394] ss:$8 sps:$4 sm:$0xff]  }
 0x253   : > { %1799 = vmatprep.subr.bf16.mxu1 %v3527_v58  ;;  %v3585_v58 = vld [vmem:[#allocation8 + $0x3b0] ss:$8 sps:$4 sm:$0xff]  }
 0x254   : > { %v901_v2 = vpack.c.bf16 %v893_v62, %v893_v62  ;;  %1763 = vmatpush1.bf16.msra.mxu0 %v3522_v60  ;;  %v3593_v60 = vld [vmem:[#allocation8 + $0x3a4] ss:$8 sps:$4 sm:$0xff]   ;;  %v892_v62 = vmax.f32 %v813_v56, 0.0 }
 0x255   : > { %1764 = vmatprep.subr.bf16.mxu0 %v3530_v61  ;;  %v3588_v61 = vld [vmem:[#allocation8 + $0x280] ss:$8 sps:$4 sm:$0xff]  }
 0x256   : > { %1800 = vmatpush1.bf16.msra.mxu1 %v3525_v63  ;;  %1786 = vmatprep.mubr.bf16.mxu0 %v901_v2  ;;  %v3591_v63 = vld [vmem:[#allocation8 + $0x3a0] ss:$8 sps:$4 sm:$0xff]   ;;  %v900_v2 = vpack.c.bf16 %v892_v62, %v892_v62 }
 0x257   : > { %v4239_v7 = vpop.f32.mrf.mxu1  ;;  %1801 = vmatprep.subr.bf16.mxu1 %v3533_v1  ;;  %v562_v1 = vrot.slane %v4212_v19, %v561_v59  ;;  %v1858_v56 = vld [vmem:[%s4085_s22 + $0xa0] sm:$0xff] }
 0x258   : > { %1765 = vmatpush1.bf16.msra.mxu0 %v3528_v3  ;;  %v3594_v3 = vld [vmem:[#allocation8 + $0x390] ss:$8 sps:$4 sm:$0xff]  }
 0x259   : > { %v885_v10 = vpop.f32.mrf.mxu1  ;;  %1766 = vmatprep.subr.bf16.mxu0 %v3536_v4  ;;  %v884_v4 = vadd.f32 %v4239_v7, %v562_v1  ;;  %v1846_v1 = vld [vmem:[%s4085_s22 + $0x40] sm:$0xff] }
 0x25a   : > { %v886_v12 = vadd.f32 %v885_v10, %v566_v6  ;;  %1802 = vmatpush1.bf16.msra.mxu1 %v3531_v5  ;;  %v3599_v5 = vld [vmem:[#allocation8 + $0x384] ss:$8 sps:$4 sm:$0xff]   ;;  %v3597_v6 = vld [vmem:[#allocation8 + $0x380] ss:$8 sps:$4 sm:$0xff]  }
 0x25b   : > { %1803 = vmatprep.subr.bf16.mxu1 %v3539_v8  ;;  %v894_v19 = vmax.f32 %v884_v4, 0.0  ;;  %v1898_v10 = vld [vmem:[%s4085_s22 + $0x1e0] sm:$0xff] }
 0x25c   : > { %v895_v15 = vmax.f32 %v886_v12, 0.0  ;;  %1767 = vmatpush1.bf16.msra.mxu0 %v3534_v9  ;;  %v1894_v9 = vld [vmem:[%s4085_s22 + $0x1c0] sm:$0xff]  ;;  %v1899_v12 = vld [vmem:[%s4085_s22 + $0x1e8] sm:$0xff] }
 0x25d   : > { %1768 = vmatprep.subr.bf16.mxu0 %v3542_v11  ;;  %v902_v8 = vpack.c.bf16 %v894_v19, %v894_v19  ;;  %v1895_v11 = vld [vmem:[%s4085_s22 + $0x1c8] sm:$0xff]  ;;  %v3193_v7 = vcombine.high %v1894_v9, %v1898_v10 }
 0x25e   : > { %v903_v22 = vpack.c.bf16 %v895_v15, %v895_v15  ;;  %1804 = vmatpush1.bf16.msra.mxu1 %v3537_v13  ;;  %v3192_v13 = vcombine.low %v1894_v9, %v1898_v10  ;;  %v3195_v15 = vcombine.high %v1895_v11, %v1899_v12  ;;  %v1842_v9 = vld [vmem:[%s4085_s22 + $0x20] sm:$0xff]  ;;  %v1839_v10 = vld [vmem:[%s4085_s22 + $0x8] sm:$0xff] }
 0x25f   : > { %1805 = vmatprep.subr.bf16.mxu1 %v3545_v14  ;;  %v3194_v14 = vcombine.low %v1895_v11, %v1899_v12  ;;  %v1843_v11 = vld [vmem:[%s4085_s22 + $0x28] sm:$0xff] }
 0x260   : > { %1769 = vmatpush1.bf16.msra.mxu0 %v3540_v16  ;;  %1827 = vmatprep.mubr.bf16.mxu1 %v903_v22  ;;  %v1886_v16 = vld [vmem:[%s4085_s22 + $0x180] sm:$0xff]  ;;  %v1887_v22 = vld [vmem:[%s4085_s22 + $0x188] sm:$0xff] }
 0x261   : > { %1770 = vmatprep.subr.bf16.mxu0 %v3548_v21  ;;  %v1890_v21 = vld [vmem:[%s4085_s22 + $0x1a0] sm:$0xff] }
 0x262   : > { %1806 = vmatpush1.bf16.msra.mxu1 %v3543_v23  ;;  %v3185_v23 = vcombine.high %v1886_v16, %v1890_v21 }
 0x263   : > { %1807 = vmatprep.subr.bf16.mxu1 %v3551_v24  ;;  %v1891_v24 = vld [vmem:[%s4085_s22 + $0x1a8] sm:$0xff] }
 0x264   : > { %1771 = vmatpush2.bf16.msra.mxu0 %v3546_v25  ;;  %v1878_v25 = vld [vmem:[%s4085_s22 + $0x140] sm:$0xff] }
 0x265   : > { %1772 = vmatprep.subr.bf16.mxu0 %v3554_v26  ;;  %v1882_v26 = vld [vmem:[%s4085_s22 + $0x160] sm:$0xff] }
 0x266   : > { %1808 = vmatpush1.bf16.msra.mxu1 %v3549_v28  ;;  %v3184_v28 = vcombine.low %v1886_v16, %v1890_v21  ;;  %v1962_v16 = vld [vmem:[%s4085_s22 + $0x3e0] sm:$0xff]  ;;  %v1959_v21 = vld [vmem:[%s4085_s22 + $0x3c8] sm:$0xff] }
 0x267   : > { %1809 = vmatprep.subr.bf16.mxu1 %v3557_v29  ;;  %v3187_v29 = vcombine.high %v1887_v22, %v1891_v24 }
 0x268   : > { %1773 = vmatpush2.bf16.msra.mxu0 %v3552_v31  ;;  %v1879_v31 = vld [vmem:[%s4085_s22 + $0x148] sm:$0xff] }
 0x269   : > { %1774 = vmatprep.subr.bf16.mxu0 %v3560_v32  ;;  %v1883_v32 = vld [vmem:[%s4085_s22 + $0x168] sm:$0xff] }
 0x26a   : > { %1810 = vmatpush1.bf16.msra.mxu1 %v3555_v33  ;;  %v3186_v33 = vcombine.low %v1887_v22, %v1891_v24  ;;  %v1963_v22 = vld [vmem:[%s4085_s22 + $0x3e8] sm:$0xff]  ;;  %v3138_v24 = vcombine.low %v1839_v10, %v1843_v11 }
 0x26b   : > { %1811 = vmatprep.subr.bf16.mxu1 %v3563_v34  ;;  %v3177_v34 = vcombine.high %v1878_v25, %v1882_v26 }
 0x26c   : > { %1775 = vmatpush2.bf16.msra.mxu0 %v3558_v35  ;;  %v3179_v35 = vcombine.high %v1879_v31, %v1883_v32 }
 0x26d   : > { %1776 = vmatprep.subr.bf16.mxu0 %v3566_v36  ;;  %v1870_v36 = vld [vmem:[%s4085_s22 + $0x100] sm:$0xff] }
 0x26e   : > { %1812 = vmatpush2.bf16.msra.mxu1 %v3561_v37  ;;  %v1874_v37 = vld [vmem:[%s4085_s22 + $0x120] sm:$0xff] }
 0x26f   : > { %1813 = vmatprep.subr.bf16.mxu1 %v3569_v38  ;;  %v1871_v38 = vld [vmem:[%s4085_s22 + $0x108] sm:$0xff]  ;;  %v3168_v50 = vcombine.low %v1870_v36, %v1874_v37 }
 0x270   : > { %1777 = vmatpush2.bf16.msra.mxu0 %v3564_v39  ;;  %v1875_v39 = vld [vmem:[%s4085_s22 + $0x128] sm:$0xff] }
 0x271   : > { %1778 = vmatprep.subr.bf16.mxu0 %v3572_v40  ;;  %v3176_v40 = vcombine.low %v1878_v25, %v1882_v26  ;;  %v3259_v26 = vcombine.high %v1959_v21, %v1963_v22 }
 0x272   : > { %1814 = vmatpush2.bf16.msra.mxu1 %v3567_v41  ;;  %v3178_v41 = vcombine.low %v1879_v31, %v1883_v32  ;;  %v1951_v31 = vld [vmem:[%s4085_s22 + $0x388] sm:$0xff] }
 0x273   : > { %1815 = vmatprep.subr.bf16.mxu1 %v3575_v42  ;;  %v3169_v42 = vcombine.high %v1870_v36, %v1874_v37  ;;  %v1955_v32 = vld [vmem:[%s4085_s22 + $0x3a8] sm:$0xff]  ;;  %v1942_v37 = vld [vmem:[%s4085_s22 + $0x340] sm:$0xff] }
 0x274   : > { %1779 = vmatpush2.bf16.msra.mxu0 %v3570_v43  ;;  %v3171_v43 = vcombine.high %v1871_v38, %v1875_v39  ;;  %v3251_v36 = vcombine.high %v1951_v31, %v1955_v32 }
 0x275   : > { %1780 = vmatprep.subr.bf16.mxu0 %v3578_v45  ;;  %v1862_v45 = vld [vmem:[%s4085_s22 + $0xc0] sm:$0xff] }
 0x276   : > { %1816 = vmatpush2.bf16.msra.mxu1 %v3573_v47  ;;  %v1866_v47 = vld [vmem:[%s4085_s22 + $0xe0] sm:$0xff] }
 0x277   : > { %1817 = vmatprep.subr.bf16.mxu1 %v3581_v48  ;;  %v1863_v48 = vld [vmem:[%s4085_s22 + $0xc8] sm:$0xff] }
 0x278   : > { %1781 = vmatpush2.bf16.msra.mxu0 %v3576_v49  ;;  %v1867_v49 = vld [vmem:[%s4085_s22 + $0xe8] sm:$0xff] }
 0x279   : > { %1782 = vmatprep.subr.bf16.mxu0 %v3584_v51  ;;  %v3170_v51 = vcombine.low %v1871_v38, %v1875_v39  ;;  %v1946_v38 = vld [vmem:[%s4085_s22 + $0x360] sm:$0xff]  ;;  %v1943_v39 = vld [vmem:[%s4085_s22 + $0x348] sm:$0xff] }
 0x27a   : > { %1818 = vmatpush2.bf16.msra.mxu1 %v3579_v52  ;;  %v3161_v52 = vcombine.high %v1862_v45, %v1866_v47 }
 0x27b   : > { %1819 = vmatprep.subr.bf16.mxu1 %v3587_v53  ;;  %v3163_v53 = vcombine.high %v1863_v48, %v1867_v49 }
 0x27c   : > { %1783 = vmatpush2.bf16.msra.mxu0 %v3582_v55  ;;  %v1854_v55 = vld [vmem:[%s4085_s22 + $0x80] sm:$0xff] }
 0x27d   : > { %1784 = vmatprep.subr.bf16.mxu0 %v3590_v57  ;;  %v1855_v57 = vld [vmem:[%s4085_s22 + $0x88] sm:$0xff]  ;;  %v3153_v62 = vcombine.high %v1854_v55, %v1858_v56  ;;  %v3152_v4 = vcombine.low %v1854_v55, %v1858_v56 }
 0x27e   : > { %1820 = vmatpush2.bf16.msra.mxu1 %v3585_v58  ;;  %v1859_v58 = vld [vmem:[%s4085_s22 + $0xa8] sm:$0xff] }
 0x27f   : > { %1821 = vmatprep.subr.bf16.mxu1 %v3593_v60  ;;  %v3160_v60 = vcombine.low %v1862_v45, %v1866_v47  ;;  %v1934_v47 = vld [vmem:[%s4085_s22 + $0x300] sm:$0xff] }
 0x280   : > { %1785 = vmatpush2.bf16.msra.mxu0 %v3588_v61  ;;  %v3162_v61 = vcombine.low %v1863_v48, %v1867_v49  ;;  %v1938_v48 = vld [vmem:[%s4085_s22 + $0x320] sm:$0xff]  ;;  %v1935_v49 = vld [vmem:[%s4085_s22 + $0x308] sm:$0xff] }
 0x281   : > { %2648 = vmatprep.subr.bf16.mxu0 %v3193_v7  ;;  %v3232_v56 = vcombine.low %v1934_v47, %v1938_v48 }
 0x282   : > { %1822 = vmatpush2.bf16.msra.mxu1 %v3591_v63  ;;  %v3155_v63 = vcombine.high %v1855_v57, %v1859_v58 }
 0x283   : > { %1787 = vmatmul.mubr.bf16.vlgmr.msra.gmra.mxu0 %v900_v2  ;;  %1823 = vmatprep.subr.bf16.mxu1 %v3596_v54  ;;  %v1850_v54 = vld [vmem:[%s4085_s22 + $0x60] sm:$0xff]  ;;  %v1847_v2 = vld [vmem:[%s4085_s22 + $0x48] sm:$0xff] }
 0x284   : > { %2649 = vmatpush1.bf16.msra.mxu0 %v3192_v13  ;;  %v3144_v7 = vcombine.low %v1846_v1, %v1850_v54 }
 0x285   : > { %2650 = vmatprep.subr.bf16.mxu0 %v3185_v23 }
 0x286   : > { %1824 = vmatpush2.bf16.msra.mxu1 %v3594_v3  ;;  %v1851_v3 = vld [vmem:[%s4085_s22 + $0x68] sm:$0xff] }
 0x287   : > { %1825 = vmatprep.subr.bf16.mxu1 %v3599_v5  ;;  %v3154_v5 = vcombine.low %v1855_v57, %v1859_v58  ;;  %v3147_v19 = vcombine.high %v1847_v2, %v1851_v3  ;;  %v3146_v12 = vcombine.low %v1847_v2, %v1851_v3  ;;  %v1926_v58 = vld [vmem:[%s4085_s22 + $0x2c0] sm:$0xff] }
 0x288   : > { %2651 = vmatpush1.bf16.msra.mxu0 %v3184_v28  ;;  %v1950_v28 = vld [vmem:[%s4085_s22 + $0x380] sm:$0xff] }
 0x289   : > { %2652 = vmatprep.subr.bf16.mxu0 %v3177_v34  ;;  %v3258_v34 = vcombine.low %v1959_v21, %v1963_v22  ;;  %v1918_v3 = vld [vmem:[%s4085_s22 + $0x280] sm:$0xff] }
 0x28a   : > { %1826 = vmatpush2.bf16.msra.mxu1 %v3597_v6  ;;  %v3145_v6 = vcombine.high %v1846_v1, %v1850_v54  ;;  %v1902_v22 = vld [vmem:[%s4085_s22 + $0x200] sm:$0xff] }
 0x28b   : > { %2689 = vmatprep.subr.bf16.mxu1 %v3195_v15  ;;  %v1958_v15 = vld [vmem:[%s4085_s22 + $0x3c0] sm:$0xff] }
 0x28c   : > { %2653 = vmatpush1.bf16.msra.mxu0 %v3176_v40  ;;  %v3257_v25 = vcombine.high %v1958_v15, %v1962_v16  ;;  %v1947_v40 = vld [vmem:[%s4085_s22 + $0x368] sm:$0xff] }
 0x28d   : > { %1828 = vmatmul.mubr.bf16.vlgmr.msra.gmra.mxu1 %v902_v8  ;;  %2654 = vmatprep.subr.bf16.mxu0 %v3169_v42  ;;  %v1838_v8 = vld [vmem:[%s4085_s22] sm:$0xff]  ;;  %v3250_v42 = vcombine.low %v1951_v31, %v1955_v32  ;;  %v3243_v45 = vcombine.high %v1943_v39, %v1947_v40  ;;  %v1896_v32 = vld [vmem:[%s4085_s22 + $0x1d0] sm:$0xff] }
 0x28e   : > { %2690 = vmatpush1.bf16.msra.mxu1 %v3194_v14  ;;  %v3137_v13 = vcombine.high %v1838_v8, %v1842_v9  ;;  %v3139_v14 = vcombine.high %v1839_v10, %v1843_v11  ;;  %v3136_v23 = vcombine.low %v1838_v8, %v1842_v9  ;;  %v1910_v11 = vld [vmem:[%s4085_s22 + $0x240] sm:$0xff] }
 0x28f   : > { %2691 = vmatprep.subr.bf16.mxu1 %v3187_v29  ;;  %v1954_v29 = vld [vmem:[%s4085_s22 + $0x3a0] sm:$0xff] }
 0x290   : > { %2655 = vmatpush1.bf16.msra.mxu0 %v3168_v50  ;;  %v1939_v50 = vld [vmem:[%s4085_s22 + $0x328] sm:$0xff] }
 0x291   : > { %2656 = vmatprep.subr.bf16.mxu0 %v3161_v52  ;;  %v3242_v52 = vcombine.low %v1943_v39, %v1947_v40  ;;  %v3235_v55 = vcombine.high %v1935_v49, %v1939_v50  ;;  %v3234_v57 = vcombine.low %v1935_v49, %v1939_v50 }
 0x292   : > { %2692 = vmatpush1.bf16.msra.mxu1 %v3186_v33  ;;  %v3256_v33 = vcombine.low %v1958_v15, %v1962_v16  ;;  %v1915_v15 = vld [vmem:[%s4085_s22 + $0x268] sm:$0xff] }
 0x293   : > { %2693 = vmatprep.subr.bf16.mxu1 %v3179_v35  ;;  %v3249_v35 = vcombine.high %v1950_v28, %v1954_v29 }
 0x294   : > { %2657 = vmatpush1.bf16.msra.mxu0 %v3160_v60  ;;  %v1930_v60 = vld [vmem:[%s4085_s22 + $0x2e0] sm:$0xff] }
 0x295   : > { %2658 = vmatprep.subr.bf16.mxu0 %v3153_v62  ;;  %v3225_v62 = vcombine.high %v1926_v58, %v1930_v60  ;;  %v3224_v1 = vcombine.low %v1926_v58, %v1930_v60 }
 0x296   : > { %2694 = vmatpush1.bf16.msra.mxu1 %v3178_v41  ;;  %v3248_v41 = vcombine.low %v1950_v28, %v1954_v29 }
 0x297   : > { %2695 = vmatprep.subr.bf16.mxu1 %v3171_v43  ;;  %v3241_v43 = vcombine.high %v1942_v37, %v1946_v38 }
 0x298   : > { %2659 = vmatpush1.bf16.msra.mxu0 %v3152_v4  ;;  %v1922_v4 = vld [vmem:[%s4085_s22 + $0x2a0] sm:$0xff] }
 0x299   : > { %2660 = vmatprep.subr.bf16.mxu0 %v3145_v6  ;;  %v3217_v6 = vcombine.high %v1918_v3, %v1922_v4  ;;  %v3216_v8 = vcombine.low %v1918_v3, %v1922_v4  ;;  %v1889_v3 = vld [vmem:[%s4085_s22 + $0x198] sm:$0xff] }
 0x29a   : > { %2696 = vmatpush1.bf16.msra.mxu1 %v3170_v51  ;;  %v3240_v51 = vcombine.low %v1942_v37, %v1946_v38  ;;  %v1893_v4 = vld [vmem:[%s4085_s22 + $0x1b8] sm:$0xff] }
 0x29b   : > { %2697 = vmatprep.subr.bf16.mxu1 %v3163_v53  ;;  %v3233_v53 = vcombine.high %v1934_v47, %v1938_v48 }
 0x29c   : > { %2661 = vmatpush1.bf16.msra.mxu0 %v3144_v7  ;;  %v1914_v7 = vld [vmem:[%s4085_s22 + $0x260] sm:$0xff] }
 0x29d   : > { %2662 = vmatprep.subr.bf16.mxu0 %v3137_v13  ;;  %v3208_v13 = vcombine.low %v1910_v11, %v1914_v7 }
 0x29e   : > { %2698 = vmatpush1.bf16.msra.mxu1 %v3162_v61  ;;  %v1927_v61 = vld [vmem:[%s4085_s22 + $0x2c8] sm:$0xff] }
 0x29f   : > { %2699 = vmatprep.subr.bf16.mxu1 %v3155_v63  ;;  %v1931_v63 = vld [vmem:[%s4085_s22 + $0x2e8] sm:$0xff] }
 0x2a0   : > { %2663 = vmatpush1.bf16.msra.mxu0 %v3136_v23  ;;  %v3226_v54 = vcombine.low %v1927_v61, %v1931_v63  ;;  %v3227_v2 = vcombine.high %v1927_v61, %v1931_v63  ;;  %v1906_v23 = vld [vmem:[%s4085_s22 + $0x220] sm:$0xff] }
 0x2a1   : > { %2664 = vmatprep.subr.bf16.mxu0 %v3257_v25  ;;  %v3201_v25 = vcombine.high %v1902_v22, %v1906_v23  ;;  %v3200_v28 = vcombine.low %v1902_v22, %v1906_v23  ;;  %v1876_v22 = vld [vmem:[%s4085_s22 + $0x130] sm:$0xff]  ;;  %v1873_v23 = vld [vmem:[%s4085_s22 + $0x118] sm:$0xff] }
 0x2a2   : > { %2700 = vmatpush1.bf16.msra.mxu1 %v3154_v5  ;;  %v1919_v5 = vld [vmem:[%s4085_s22 + $0x288] sm:$0xff] }
 0x2a3   : > { %2701 = vmatprep.subr.bf16.mxu1 %v3147_v19  ;;  %v1923_v19 = vld [vmem:[%s4085_s22 + $0x2a8] sm:$0xff] }
 0x2a4   : > { %2665 = vmatpush2.bf16.msra.mxu0 %v3256_v33  ;;  %v3218_v9 = vcombine.low %v1919_v5, %v1923_v19  ;;  %v3219_v10 = vcombine.high %v1919_v5, %v1923_v19  ;;  %v1900_v33 = vld [vmem:[%s4085_s22 + $0x1f0] sm:$0xff] }
 0x2a5   : > { %2666 = vmatprep.subr.bf16.mxu0 %v3249_v35  ;;  %v3197_v35 = vcombine.high %v1896_v32, %v1900_v33  ;;  %v3196_v37 = vcombine.low %v1896_v32, %v1900_v33  ;;  %v1868_v32 = vld [vmem:[%s4085_s22 + $0xf0] sm:$0xff]  ;;  %v1865_v33 = vld [vmem:[%s4085_s22 + $0xd8] sm:$0xff] }
 0x2a6   : > { %2702 = vmatpush1.bf16.msra.mxu1 %v3146_v12  ;;  %v1911_v12 = vld [vmem:[%s4085_s22 + $0x248] sm:$0xff] }
 0x2a7   : > { %2703 = vmatprep.subr.bf16.mxu1 %v3139_v14  ;;  %v3209_v14 = vcombine.high %v1910_v11, %v1914_v7  ;;  %v3210_v16 = vcombine.low %v1911_v12, %v1915_v15  ;;  %v3211_v21 = vcombine.high %v1911_v12, %v1915_v15  ;;  %v1884_v11 = vld [vmem:[%s4085_s22 + $0x170] sm:$0xff]  ;;  %v1881_v7 = vld [vmem:[%s4085_s22 + $0x158] sm:$0xff] }
 0x2a8   : > { %2667 = vmatpush2.bf16.msra.mxu0 %v3248_v41  ;;  %v1885_v12 = vld [vmem:[%s4085_s22 + $0x178] sm:$0xff] }
 0x2a9   : > { %2668 = vmatprep.subr.bf16.mxu0 %v3241_v43 }
 0x2aa   : > { %2704 = vmatpush1.bf16.msra.mxu1 %v3138_v24  ;;  %v1903_v24 = vld [vmem:[%s4085_s22 + $0x208] sm:$0xff] }
 0x2ab   : > { %2705 = vmatprep.subr.bf16.mxu1 %v3259_v26  ;;  %v1907_v26 = vld [vmem:[%s4085_s22 + $0x228] sm:$0xff] }
 0x2ac   : > { %2669 = vmatpush2.bf16.msra.mxu0 %v3240_v51  ;;  %v3202_v29 = vcombine.low %v1903_v24, %v1907_v26  ;;  %v3203_v31 = vcombine.high %v1903_v24, %v1907_v26  ;;  %v1877_v24 = vld [vmem:[%s4085_s22 + $0x138] sm:$0xff]  ;;  %v3182_v26 = vcombine.low %v1881_v7, %v1885_v12 }
 0x2ad   : > { %2670 = vmatprep.subr.bf16.mxu0 %v3233_v53 }
 0x2ae   : > { %2706 = vmatpush2.bf16.msra.mxu1 %v3258_v34  ;;  %v1897_v34 = vld [vmem:[%s4085_s22 + $0x1d8] sm:$0xff] }
 0x2af   : > { %2707 = vmatprep.subr.bf16.mxu1 %v3251_v36  ;;  %v1901_v36 = vld [vmem:[%s4085_s22 + $0x1f8] sm:$0xff] }
 0x2b0   : > { %2671 = vmatpush2.bf16.msra.mxu0 %v3232_v56  ;;  %v3198_v38 = vcombine.low %v1897_v34, %v1901_v36  ;;  %v3199_v39 = vcombine.high %v1897_v34, %v1901_v36  ;;  %v1869_v34 = vld [vmem:[%s4085_s22 + $0xf8] sm:$0xff]  ;;  %v3174_v36 = vcombine.low %v1873_v23, %v1877_v24 }
 0x2b1   : > { %2672 = vmatprep.subr.bf16.mxu0 %v3225_v62 }
 0x2b2   : > { %2708 = vmatpush2.bf16.msra.mxu1 %v3250_v42 }
 0x2b3   : > { %2709 = vmatprep.subr.bf16.mxu1 %v3243_v45 }
 0x2b4   : > { %2673 = vmatpush2.bf16.msra.mxu0 %v3224_v1  ;;  %v1888_v1 = vld [vmem:[%s4085_s22 + $0x190] sm:$0xff] }
 0x2b5   : > { %2674 = vmatprep.subr.bf16.mxu0 %v3217_v6 }
 0x2b6   : > { %2710 = vmatpush2.bf16.msra.mxu1 %v3242_v52 }
 0x2b7   : > { %2711 = vmatprep.subr.bf16.mxu1 %v3235_v55 }
 0x2b8   : > { %2675 = vmatpush2.bf16.msra.mxu0 %v3216_v8  ;;  %v1880_v8 = vld [vmem:[%s4085_s22 + $0x150] sm:$0xff] }
 0x2b9   : > { %2676 = vmatprep.subr.bf16.mxu0 %v3209_v14  ;;  %v3190_v14 = vcombine.low %v1889_v3, %v1893_v4  ;;  %v3181_v15 = vcombine.high %v1880_v8, %v1884_v11 }
 0x2ba   : > { %2712 = vmatpush2.bf16.msra.mxu1 %v3234_v57 }
 0x2bb   : > { %2713 = vmatprep.subr.bf16.mxu1 %v3227_v2  ;;  %v1892_v2 = vld [vmem:[%s4085_s22 + $0x1b0] sm:$0xff] }
 0x2bc   : > { %2677 = vmatpush2.bf16.msra.mxu0 %v3208_v13  ;;  %v3188_v13 = vcombine.low %v1888_v1, %v1892_v2 }
 0x2bd   : > { %2678 = vmatprep.subr.bf16.mxu0 %v3201_v25  ;;  %v3180_v25 = vcombine.low %v1880_v8, %v1884_v11 }
 0x2be   : > { %2714 = vmatpush2.bf16.msra.mxu1 %v3226_v54 }
 0x2bf   : > { %2715 = vmatprep.subr.bf16.mxu1 %v3219_v10  ;;  %v3191_v10 = vcombine.high %v1889_v3, %v1893_v4  ;;  %v1960_v3 = vld [vmem:[%s4085_s22 + $0x3d0] sm:$0xff] }
 0x2c0   : > { %2679 = vmatpush2.bf16.msra.mxu0 %v3200_v28  ;;  %v1964_v4 = vld [vmem:[%s4085_s22 + $0x3f0] sm:$0xff] }
 0x2c1   : > { %2730 = vmatprep.subr.bf16.mxu0 %v3197_v35 }
 0x2c2   : > { %2716 = vmatpush2.bf16.msra.mxu1 %v3218_v9  ;;  %v3189_v9 = vcombine.high %v1888_v1, %v1892_v2 }
 0x2c3   : > { %2717 = vmatprep.subr.bf16.mxu1 %v3211_v21  ;;  %v1872_v21 = vld [vmem:[%s4085_s22 + $0x110] sm:$0xff] }
 0x2c4   : > { %v3173_v28 = vcombine.high %v1872_v21, %v1876_v22  ;;  %v3172_v35 = vcombine.low %v1872_v21, %v1876_v22 }
 0x2c6   : > { %2718 = vmatpush2.bf16.msra.mxu1 %v3210_v16  ;;  %v3183_v16 = vcombine.high %v1881_v7, %v1885_v12  ;;  %v1952_v7 = vld [vmem:[%s4085_s22 + $0x390] sm:$0xff] }
 0x2c7   : > { %2719 = vmatprep.subr.bf16.mxu1 %v3203_v31  ;;  %v1864_v31 = vld [vmem:[%s4085_s22 + $0xd0] sm:$0xff] }
 0x2c8   : > { %v1956_v12 = vld [vmem:[%s4085_s22 + $0x3b0] sm:$0xff] }
 0x2c9   : > { %v3253_v21 = vcombine.high %v1952_v7, %v1956_v12 }
 0x2ca   : > { %2720 = vmatpush2.bf16.msra.mxu1 %v3202_v29  ;;  %v3175_v29 = vcombine.high %v1873_v23, %v1877_v24  ;;  %v1944_v23 = vld [vmem:[%s4085_s22 + $0x350] sm:$0xff] }
 0x2cb   : > { %2771 = vmatprep.subr.bf16.mxu1 %v3199_v39  ;;  %v1856_v39 = vld [vmem:[%s4085_s22 + $0x90] sm:$0xff] }
 0x2cc   : > { %v1948_v24 = vld [vmem:[%s4085_s22 + $0x370] sm:$0xff] }
 0x303   : > { %v1706_v40 = vpop.f32.mrf.mxu0 }
 0x305   : > { %v1708_v41 = vpop.f32.mrf.mxu0 }
 0x307   : > { %v1710_v42 = vpop.f32.mrf.mxu0 }
 0x308   : > { %v1861_v42 = vld [vmem:[%s4085_s22 + $0xb8] sm:$0xff] }
 0x309   : > { %v1711_v43 = vpop.f32.mrf.mxu0 }
 0x30a   : > { %v3164_v43 = vcombine.low %v1864_v31, %v1868_v32 }
 0x30d   : > { %v1747_v45 = vpop.f32.mrf.mxu1 }
 0x30e   : > { %v1748_v55 = vadd.f32 %v1747_v45, %v1706_v40  ;;  %v1860_v40 = vld [vmem:[%s4085_s22 + $0xb0] sm:$0xff]  ;;  %v3166_v45 = vcombine.low %v1865_v33, %v1869_v34 }
 0x30f   : > { %v1749_v47 = vpop.f32.mrf.mxu1 }
 0x310   : > { %v1750_v56 = vadd.f32 %v1749_v47, %v1708_v41  ;;  %v1857_v41 = vld [vmem:[%s4085_s22 + $0x98] sm:$0xff]  ;;  %v3157_v47 = vcombine.high %v1856_v39, %v1860_v40 }
 0x311   : > { %v1751_v48 = vpop.f32.mrf.mxu1 }
 0x312   : > { %v3159_v48 = vcombine.high %v1857_v41, %v1861_v42 }
 0x313   : > { %v1752_v49 = vpop.f32.mrf.mxu1 }
 0x314   : > { %v1848_v49 = vld [vmem:[%s4085_s22 + $0x50] sm:$0xff] }
 0x343   : > { %v1788_v50 = vpop.f32.mrf.mxu0 }
 0x344   : > { %v1789_v57 = vadd.f32 %v1788_v50, %v1748_v55  ;;  %v1852_v50 = vld [vmem:[%s4085_s22 + $0x70] sm:$0xff]  ;;  %v3158_v55 = vcombine.low %v1857_v41, %v1861_v42 }
 0x345   : > { %v1790_v51 = vpop.f32.mrf.mxu0  ;;  %v1928_v41 = vld [vmem:[%s4085_s22 + $0x2d0] sm:$0xff] }
 0x346   : > { %v1791_v60 = vadd.f32 %v1790_v51, %v1750_v56  ;;  %v1849_v51 = vld [vmem:[%s4085_s22 + $0x58] sm:$0xff]  ;;  %v3149_v56 = vcombine.high %v1848_v49, %v1852_v50  ;;  %v1932_v42 = vld [vmem:[%s4085_s22 + $0x2f0] sm:$0xff] }
 0x347   : > { %v1792_v52 = vpop.f32.mrf.mxu0 }
 0x348   : > { %v1853_v52 = vld [vmem:[%s4085_s22 + $0x78] sm:$0xff] }
 0x349   : > { %v1793_v53 = vpop.f32.mrf.mxu0  ;;  %v3150_v1 = vcombine.low %v1849_v51, %v1853_v52 }
 0x34a   : > { %v3156_v53 = vcombine.low %v1856_v39, %v1860_v40 }
 0x34d   : > { %v1829_v58 = vpop.f32.mrf.mxu1 }
 0x34e   : > { %v1830_v61 = vadd.f32 %v1829_v58, %v1789_v57  ;;  %v3151_v57 = vcombine.high %v1849_v51, %v1853_v52  ;;  %v1840_v58 = vld [vmem:[%s4085_s22 + $0x10] sm:$0xff] }
 0x34f   : > { %v1831_v62 = vpop.f32.mrf.mxu1  ;;  %v1920_v51 = vld [vmem:[%s4085_s22 + $0x290] sm:$0xff] }
 0x350   : > { %v1832_v63 = vadd.f32 %v1831_v62, %v1791_v60  ;;  %v4323_v6 = vpack.c.bf16 %v1830_v61, %v1830_v61  ;;  %v1844_v60 = vld [vmem:[%s4085_s22 + $0x30] sm:$0xff]  ;;  %v1841_v61 = vld [vmem:[%s4085_s22 + $0x18] sm:$0xff] }
 0x351   : > { %v1833_v54 = vpop.f32.mrf.mxu1  ;;  %v1845_v62 = vld [vmem:[%s4085_s22 + $0x38] sm:$0xff]  ;;  %v3140_v8 = vcombine.low %v1840_v58, %v1844_v60  ;;  %v1924_v52 = vld [vmem:[%s4085_s22 + $0x2b0] sm:$0xff] }
 0x352   : > { %v1837_v5 = vpack.c.bf16 %v1832_v63, %v1832_v63  ;;  %v3148_v63 = vcombine.low %v1848_v49, %v1852_v50  ;;  %v3141_v54 = vcombine.high %v1840_v58, %v1844_v60  ;;  %v3143_v2 = vcombine.high %v1841_v61, %v1845_v62 }
 0x353   : > { %v1834_v19 = vpop.f32.mrf.mxu1  ;;  %v3229_v49 = vcombine.high %v1928_v41, %v1932_v42  ;;  %v3221_v58 = vcombine.high %v1920_v51, %v1924_v52 }
 0x354   : > { %2680 = vmatprep.mubr.bf16.mxu0 %v1837_v5  ;;  %2721 = vmatprep.mubr.bf16.mxu1 %v1837_v5  ;;  %v1965_v19 = vld [vmem:[%s4085_s22 + $0x3f8] sm:$0xff] }
 0x355   : > { %2681 = vmatmul.mubr.bf16.vlgmr.msra.gmra.mxu0 %v4323_v6  ;;  %2722 = vmatmul.mubr.bf16.vlgmr.msra.gmra.mxu1 %v4323_v6 }
 0x356   : > { %2731 = vmatpush1.bf16.msra.mxu0 %v3196_v37  ;;  %2772 = vmatpush1.bf16.msra.mxu1 %v3198_v38  ;;  %v3165_v37 = vcombine.high %v1864_v31, %v1868_v32  ;;  %v3167_v38 = vcombine.high %v1865_v33, %v1869_v34  ;;  %v3245_v31 = vcombine.high %v1944_v23, %v1948_v24  ;;  %v1936_v33 = vld [vmem:[%s4085_s22 + $0x310] sm:$0xff] }
 0x357   : > { %2762 = vmatprep.mubr.bf16.mxu0 %v1837_v5  ;;  %2803 = vmatprep.mubr.bf16.mxu1 %v1837_v5  ;;  %v1961_v5 = vld [vmem:[%s4085_s22 + $0x3d8] sm:$0xff]  ;;  %v1940_v34 = vld [vmem:[%s4085_s22 + $0x330] sm:$0xff] }
 0x358   : > { %2732 = vmatprep.subr.bf16.mxu0 %v3189_v9  ;;  %2773 = vmatprep.subr.bf16.mxu1 %v3191_v10  ;;  %v3142_v9 = vcombine.low %v1841_v61, %v1845_v62  ;;  %v3261_v10 = vcombine.high %v1960_v3, %v1964_v4  ;;  %v3263_v11 = vcombine.high %v1961_v5, %v1965_v19  ;;  %v1912_v61 = vld [vmem:[%s4085_s22 + $0x250] sm:$0xff] }
 0x359   : > { %v3237_v39 = vcombine.high %v1936_v33, %v1940_v34  ;;  %v1916_v62 = vld [vmem:[%s4085_s22 + $0x270] sm:$0xff] }
 0x35a   : > { %2733 = vmatpush1.bf16.msra.mxu0 %v3188_v13  ;;  %2774 = vmatpush1.bf16.msra.mxu1 %v3190_v14  ;;  %v1953_v13 = vld [vmem:[%s4085_s22 + $0x398] sm:$0xff] }
 0x35b   : > { %2734 = vmatprep.subr.bf16.mxu0 %v3181_v15  ;;  %2775 = vmatprep.subr.bf16.mxu1 %v3183_v16  ;;  %v1957_v14 = vld [vmem:[%s4085_s22 + $0x3b8] sm:$0xff]  ;;  %v3260_v15 = vcombine.low %v1960_v3, %v1964_v4  ;;  %v3262_v16 = vcombine.low %v1961_v5, %v1965_v19  ;;  %v3213_v3 = vcombine.high %v1912_v61, %v1916_v62  ;;  %v1904_v5 = vld [vmem:[%s4085_s22 + $0x210] sm:$0xff] }
 0x35c   : > { %v3255_v22 = vcombine.high %v1953_v13, %v1957_v14  ;;  %v1908_v19 = vld [vmem:[%s4085_s22 + $0x230] sm:$0xff] }
 0x35e   : > { %2735 = vmatpush1.bf16.msra.mxu0 %v3180_v25  ;;  %2776 = vmatpush1.bf16.msra.mxu1 %v3182_v26  ;;  %v1945_v25 = vld [vmem:[%s4085_s22 + $0x358] sm:$0xff] }
 0x35f   : > { %2736 = vmatprep.subr.bf16.mxu0 %v3173_v28  ;;  %2777 = vmatprep.subr.bf16.mxu1 %v3175_v29  ;;  %v1949_v26 = vld [vmem:[%s4085_s22 + $0x378] sm:$0xff]  ;;  %v3252_v28 = vcombine.low %v1952_v7, %v1956_v12  ;;  %v3254_v29 = vcombine.low %v1953_v13, %v1957_v14  ;;  %v3205_v7 = vcombine.high %v1904_v5, %v1908_v19 }
 0x360   : > { %v3247_v32 = vcombine.high %v1945_v25, %v1949_v26  ;;  %v3204_v13 = vcombine.low %v1904_v5, %v1908_v19 }
 0x362   : > { %2737 = vmatpush1.bf16.msra.mxu0 %v3172_v35  ;;  %2778 = vmatpush1.bf16.msra.mxu1 %v3174_v36  ;;  %v1937_v35 = vld [vmem:[%s4085_s22 + $0x318] sm:$0xff] }
 0x363   : > { %2738 = vmatprep.subr.bf16.mxu0 %v3165_v37  ;;  %2779 = vmatprep.subr.bf16.mxu1 %v3167_v38  ;;  %v1941_v36 = vld [vmem:[%s4085_s22 + $0x338] sm:$0xff]  ;;  %v3244_v37 = vcombine.low %v1944_v23, %v1948_v24  ;;  %v3246_v38 = vcombine.low %v1945_v25, %v1949_v26 }
 0x364   : > { %v3239_v40 = vcombine.high %v1937_v35, %v1941_v36 }
 0x366   : > { %2739 = vmatpush1.bf16.msra.mxu0 %v3164_v43  ;;  %2780 = vmatpush1.bf16.msra.mxu1 %v3166_v45  ;;  %v1929_v43 = vld [vmem:[%s4085_s22 + $0x2d8] sm:$0xff] }
 0x367   : > { %2740 = vmatprep.subr.bf16.mxu0 %v3157_v47  ;;  %2781 = vmatprep.subr.bf16.mxu1 %v3159_v48  ;;  %v1933_v45 = vld [vmem:[%s4085_s22 + $0x2f8] sm:$0xff]  ;;  %v3236_v47 = vcombine.low %v1936_v33, %v1940_v34  ;;  %v3238_v48 = vcombine.low %v1937_v35, %v1941_v36 }
 0x368   : > { %v3231_v50 = vcombine.high %v1929_v43, %v1933_v45 }
 0x36a   : > { %2741 = vmatpush1.bf16.msra.mxu0 %v3156_v53  ;;  %2782 = vmatpush1.bf16.msra.mxu1 %v3158_v55  ;;  %v1921_v53 = vld [vmem:[%s4085_s22 + $0x298] sm:$0xff] }
 0x36b   : > { %2742 = vmatprep.subr.bf16.mxu0 %v3149_v56  ;;  %2783 = vmatprep.subr.bf16.mxu1 %v3151_v57  ;;  %v1925_v55 = vld [vmem:[%s4085_s22 + $0x2b8] sm:$0xff]  ;;  %v3228_v56 = vcombine.low %v1928_v41, %v1932_v42  ;;  %v3230_v57 = vcombine.low %v1929_v43, %v1933_v45 }
 0x36c   : > { %v3223_v60 = vcombine.high %v1921_v53, %v1925_v55 }
 0x36e   : > { %2743 = vmatpush1.bf16.msra.mxu0 %v3148_v63  ;;  %2784 = vmatpush1.bf16.msra.mxu1 %v3150_v1  ;;  %v1913_v63 = vld [vmem:[%s4085_s22 + $0x258] sm:$0xff] }
 0x36f   : > { %2744 = vmatprep.subr.bf16.mxu0 %v3141_v54  ;;  %2785 = vmatprep.subr.bf16.mxu1 %v3143_v2  ;;  %v1917_v1 = vld [vmem:[%s4085_s22 + $0x278] sm:$0xff]  ;;  %v3220_v54 = vcombine.low %v1920_v51, %v1924_v52  ;;  %v3222_v2 = vcombine.low %v1921_v53, %v1925_v55 }
 0x370   : > { %v3215_v4 = vcombine.high %v1913_v63, %v1917_v1 }
 0x372   : > { %2745 = vmatpush1.bf16.msra.mxu0 %v3140_v8  ;;  %2786 = vmatpush1.bf16.msra.mxu1 %v3142_v9  ;;  %v1905_v8 = vld [vmem:[%s4085_s22 + $0x218] sm:$0xff] }
 0x373   : > { %2746 = vmatprep.subr.bf16.mxu0 %v3261_v10  ;;  %2787 = vmatprep.subr.bf16.mxu1 %v3263_v11  ;;  %v1909_v9 = vld [vmem:[%s4085_s22 + $0x238] sm:$0xff]  ;;  %v3212_v10 = vcombine.low %v1912_v61, %v1916_v62  ;;  %v3214_v11 = vcombine.low %v1913_v63, %v1917_v1  ;;  %s2994_s22 = sshll.u32 %s4082_s24, 3 }
 0x374   : > { %v3207_v12 = vcombine.high %v1905_v8, %v1909_v9  ;;  %v3206_v14 = vcombine.low %v1905_v8, %v1909_v9  ;;  %s348_s20 = scalar_lea.vmem [#allocation11], %s2994_s22 }
 0x376   : > { %2747 = vmatpush2.bf16.msra.mxu0 %v3260_v15  ;;  %2788 = vmatpush2.bf16.msra.mxu1 %v3262_v16  ;;  %v1966_v15 = vld [vmem:[%s348_s20] sm:$0xff] }
 0x377   : > { %2748 = vmatprep.subr.bf16.mxu0 %v3253_v21  ;;  %2789 = vmatprep.subr.bf16.mxu1 %v3255_v22  ;;  %v1971_v16 = vrot.slane %v1966_v15, %v537_v18  ;;  %v1979_v21 = vrot.slane %v1966_v15, %v545_v27  ;;  %v1975_v22 = vrot.slane %v1966_v15, %v541_v20 }
 0x378   : > { %v1983_v23 = vrot.slane %v1966_v15, %v549_v30  ;;  %v1987_v20 = vrot.slane %v1966_v15, %v553_v44  ;;  %v1995_v30 = vrot.slane %v1966_v15, %v561_v59 }
 0x37a   : > { %2749 = vmatpush2.bf16.msra.mxu0 %v3252_v28  ;;  %2790 = vmatpush2.bf16.msra.mxu1 %v3254_v29 }
 0x37b   : > { %2750 = vmatprep.subr.bf16.mxu0 %v3245_v31  ;;  %2791 = vmatprep.subr.bf16.mxu1 %v3247_v32 }
 0x37e   : > { %2751 = vmatpush2.bf16.msra.mxu0 %v3244_v37  ;;  %2792 = vmatpush2.bf16.msra.mxu1 %v3246_v38  ;;  %v1991_v37 = vrot.slane %v1966_v15, %v557_v46  ;;  %v1999_v38 = vrot.slane %v1966_v15, %v565_v0 }
 0x37f   : > { %2752 = vmatprep.subr.bf16.mxu0 %v3237_v39  ;;  %2793 = vmatprep.subr.bf16.mxu1 %v3239_v40 }
 0x382   : > { %2753 = vmatpush2.bf16.msra.mxu0 %v3236_v47  ;;  %2794 = vmatpush2.bf16.msra.mxu1 %v3238_v48 }
 0x383   : > { %2754 = vmatprep.subr.bf16.mxu0 %v3229_v49  ;;  %2795 = vmatprep.subr.bf16.mxu1 %v3231_v50 }
 0x386   : > { %2755 = vmatpush2.bf16.msra.mxu0 %v3228_v56  ;;  %2796 = vmatpush2.bf16.msra.mxu1 %v3230_v57 }
 0x387   : > { %2756 = vmatprep.subr.bf16.mxu0 %v3221_v58  ;;  %2797 = vmatprep.subr.bf16.mxu1 %v3223_v60 }
 0x38a   : > { %2757 = vmatpush2.bf16.msra.mxu0 %v3220_v54  ;;  %2798 = vmatpush2.bf16.msra.mxu1 %v3222_v2 }
 0x38b   : > { %2758 = vmatprep.subr.bf16.mxu0 %v3213_v3  ;;  %2799 = vmatprep.subr.bf16.mxu1 %v3215_v4 }
 0x38e   : > { %2759 = vmatpush2.bf16.msra.mxu0 %v3212_v10  ;;  %2800 = vmatpush2.bf16.msra.mxu1 %v3214_v11 }
 0x38f   : > { %2760 = vmatprep.subr.bf16.mxu0 %v3205_v7  ;;  %2801 = vmatprep.subr.bf16.mxu1 %v3207_v12 }
 0x392   : > { %2761 = vmatpush2.bf16.msra.mxu0 %v3204_v13  ;;  %2802 = vmatpush2.bf16.msra.mxu1 %v3206_v14 }
 0x395   : > { %2763 = vmatmul.mubr.bf16.vlgmr.msra.gmra.mxu0 %v4323_v6  ;;  %2804 = vmatmul.mubr.bf16.vlgmr.msra.gmra.mxu1 %v4323_v6 }
 0x415   : > { %v2682_v24 = vpop.f32.mrf.mxu0  ;;  %v2723_v25 = vpop.f32.mrf.mxu1 }
 0x416   : > { %v2683_v28 = vadd.f32 %v2682_v24, %v1971_v16  ;;  %v2724_v29 = vadd.f32 %v2723_v25, %v1979_v21 }
 0x417   : > { %v2684_v26 = vpop.f32.mrf.mxu0  ;;  %v2725_v6 = vpop.f32.mrf.mxu1 }
 0x418   : > { %v2685_v31 = vadd.f32 %v2684_v26, %v1975_v22  ;;  %v2726_v32 = vadd.f32 %v2725_v6, %v1983_v23 }
 0x419   : > { %v2686_v33 = vpop.f32.mrf.mxu0  ;;  %v2727_v18 = vpop.f32.mrf.mxu1 }
 0x41a   : > { %v2820_v34 = vcombine.low %v2683_v28, %v2685_v31  ;;  %v2821_v27 = vcombine.low %v2724_v29, %v2726_v32 }
 0x41b   : > { %v2687_v35 = vpop.f32.mrf.mxu0  ;;  %v2728_v36 = vpop.f32.mrf.mxu1 }
 0x41c   : > { %2828 = vst [vmem:[%s383_s29] sm:$0xff] %v2820_v34  ;;  %2829 = vst [vmem:[%s383_s29 + $0x8] sm:$0xff] %v2821_v27 }
 0x455   : > { %v2764_v39 = vpop.f32.mrf.mxu0  ;;  %v2805_v40 = vpop.f32.mrf.mxu1 }
 0x456   : > { %v2765_v43 = vadd.f32 %v2764_v39, %v1987_v20  ;;  %v2806_v45 = vadd.f32 %v2805_v40, %v1995_v30 }
 0x457   : > { %v2766_v41 = vpop.f32.mrf.mxu0  ;;  %v2807_v42 = vpop.f32.mrf.mxu1 }
 0x458   : > { %v2767_v44 = vadd.f32 %v2766_v41, %v1991_v37  ;;  %v2808_v47 = vadd.f32 %v2807_v42, %v1999_v38 }
 0x459   : > { %v2768_v48 = vpop.f32.mrf.mxu0  ;;  %v2809_v59 = vpop.f32.mrf.mxu1 }
 0x45a   : > { %v2822_v49 = vcombine.low %v2765_v43, %v2767_v44  ;;  %v2823_v50 = vcombine.low %v2806_v45, %v2808_v47 }
 0x45b   : > { %v2769_v17 = vpop.f32.mrf.mxu0  ;;  %v2810_v46 = vpop.f32.mrf.mxu1 }
 0x45c   : > { %2830 = vst [vmem:[%s383_s29 + $0x10] sm:$0xff] %v2822_v49  ;;  %2831 = vst [vmem:[%s383_s29 + $0x18] sm:$0xff] %v2823_v50 }
 0x45d   : > { %3773 = shalt.err (!%p3770_p0)
}
 0x45e   : > { %s3774_s30 = scalar_lea.hbm %s4407_s19, 512  ;;  %s3778_s23 = scalar_lea.hbm %s4456_s7, 2048 }
 0x45f   : > { %p3775_p11 = scmp.ne.s32.totalorder %s4407_s19, %s3774_s30  ;;  %p3779_p5 = scmp.lt.s32.totalorder %s4407_s19, %s4456_s7 }
 0x460   : > { %p3780_p3 = scmp.lt.s32.totalorder %s3778_s23, %s3774_s30 }
 0x461   : > { %p3776_p6 = pnand %p3775_p11, %p4491_p7 }
 0x462   : > { %p3781_p1 = por %p3780_p3, %p3779_p5 }
 0x463   : > { %p3777_p10 = pneg %p3776_p6 }
 0x465   : > { %p3782_p13 = pnand %p3781_p1, %p3777_p10 }
 0x467   : > { %3785 = shalt.err (!%p3782_p13)
}
 0x468   : > { %3327 = dma.vmem_to_hbm [thread:$0]  (%p4491_p7), %s4409_s0, 512, %s4407_s19, %s2833_s28  }
 0x469 PF: > { %s4492_s17 = sld [smem:[#allocation18_spill]]  ;;  %p3362_p2 = scmp.ge.s32.totalorder %s3836_s27, 2 }
 0x46a   : > { %s4493_s22 = sld [smem:[#allocation21_spill]] }
 0x46f   : > { %s2859_s20 = sand.u32 1, %s4492_s17  }
 0x470   : > { %p4494_p8 = scmp.ne.s32.totalorder %s4493_s22, 0  ;;  %s2860_s14 = scalar_lea.sflag [#allocation4], %s2859_s20 }
 0x472   : > { %p3350_p9 = pnand %p3362_p2, %p4494_p8 }
 0x474   : > { %p3351_p4 = pneg %p3350_p9 }
 0x476   : > { %3819 = dma.done.wait (%p3351_p4), %s2860_s14, 512  }
 0x477   : > { %3821 = vsyncadd (%p3351_p4), %s2860_s14, 4294966784  ;;  %s4495_s27 = sld [smem:[#allocation19_spill]]  ;;  %s4497_s24 = smov %s3828_s25 }
 0x478   : > { %s4496_s29 = sld [smem:[#allocation20_spill]]  ;;  %s4498_s25 = smov %s3832_s26 }
 0x47d   : > { %p20_p12 = scmp.ge.s32.totalorder %s4495_s27, 6  }
 0x47e   : > { %s4499_s26 = smov %s4496_s29 }
 0x47f   :  { %22 = sbr.rel (!%p20_p12) target bundleno = 9 (0x9), region = 119 }
 0x484   :  { %2865 = vsyncpa [#allocation3], 1 }
 0x485   :  { %2867 = vsyncpa [#allocation3 + $0x1], 1 }
 0x486   :  { %2868 = vsyncpa [#allocation6], 1 }
 0x487   :  { %2869 = vsyncpa [#allocation9], 1 }
 0x488   :  { %2870 = vsyncpa [#allocation4], 1 }
 0x489   :  { %2872 = vsyncpa [#allocation4 + $0x1], 1 }

</bundles_post_ra>
